<compile_context>
chip_gen: v7x
topology: tpu7x:2x2x1
jax: 0.10.0
libtpu: 0.0.40
codegen_flags: <defaults>
</compile_context>

<pallas_src>
import functools
import math

import jax
import jax.numpy as jnp
from jax import lax
from jax.experimental import pallas as pl
from jax.experimental.pallas import tpu as pltpu


def _round_up(x, m):
    return -(-x // m) * m


# ----------------------------------------------------------------------------
# Fused Conv2d + InstanceNorm2d(affine=False) + ReLU  (one Pallas kernel)
# ----------------------------------------------------------------------------
def _conv_in_relu_kernel(x_ref, w_ref, o_ref, slab_ref, *, K, S, Ho, Wo, eps):
    """Grid step = (batch element, Cout tile).

    x_ref:    (1, S, S, Hq, Wq, Cin) f32 stride-phase-split, zero-padded input
    w_ref:    (K*K*Cin, CT)          bf16 im2col-ordered weights (Cout zero-padded)
    o_ref:    (1, Ho*Wo, CT)         f32
    slab_ref: (Ho*Wo, K*K*Cin)       f32 VMEM scratch (im2col slab, built once)
    """
    cin = x_ref.shape[-1]

    # Build the im2col slab once from K*K contiguous window slices.
    # (Re-built redundantly per Cout tile; cheap relative to the matmul.)
    for dy in range(K):
        ph_y, q_y = dy % S, dy // S
        for dx in range(K):
            ph_x, q_x = dx % S, dx // S
            # Output pixel (y, x) reads padded input row y*S+dy, col x*S+dx,
            # i.e. phase (ph_y, ph_x) at (q_y + y, q_x + x): a contiguous slice.
            t = x_ref[0, ph_y, ph_x, q_y:q_y + Ho, q_x:q_x + Wo, :]
            c0 = (dy * K + dx) * cin
            slab_ref[:, c0:c0 + cin] = t.reshape(Ho * Wo, cin)

    # One MXU push: contraction depth K*K*Cin (instead of K*K dots of depth Cin),
    # bf16 operands, f32 accumulation.
    slab = slab_ref[...].astype(jnp.bfloat16)
    acc = jnp.dot(slab, w_ref[...], preferred_element_type=jnp.float32)

    # InstanceNorm2d (affine=False, biased variance) over this image's spatial
    # positions; stats are per-channel so tiling Cout across the grid is safe.
    # Conv bias is intentionally absent: the mean subtraction cancels it exactly.
    # Zero-padded Cout lanes give mean=0, var=0 -> finite rsqrt(eps) -> output 0.
    mean = jnp.mean(acc, axis=0, keepdims=True)
    cent = acc - mean
    var = jnp.mean(cent * cent, axis=0, keepdims=True)
    y = cent * lax.rsqrt(var + eps)
    o_ref[0] = jnp.maximum(y, 0.0).astype(o_ref.dtype)


def conv_in_relu(x_nhwc, w, *, kernel, stride, pad, eps=1e-5):
    """relu(instance_norm(conv2d(x, w, stride, pad)))  in NHWC (f32 in/out)."""
    N, H, W, Cin = x_nhwc.shape
    K, S, P = kernel, stride, pad
    KK, Cin_w, Cout = w.shape
    assert KK == K * K and Cin_w == Cin, (w.shape, K, Cin)
    Ho = (H + 2 * P - K) // S + 1
    Wo = (W + 2 * P - K) // S + 1
    assert Ho > 0 and Wo > 0
    KKC = K * K * Cin

    # Lane-dense output: pad Cout up to a multiple of 128; tile it on the grid.
    Cout_pad = _round_up(Cout, 128)
    CT = 256 if Cout_pad % 256 == 0 else 128
    n_ct = Cout_pad // CT

    # Weights in im2col order, bf16, zero-padded on the Cout axis.
    w2 = w.reshape(KKC, Cout).astype(jnp.bfloat16)
    w2 = jnp.pad(w2, ((0, 0), (0, Cout_pad - Cout)))

    # Zero-pad (conv padding) and round spatial dims up to a multiple of the
    # stride so the phase split below is rectangular.
    Hq = -(-(H + 2 * P) // S)
    Wq = -(-(W + 2 * P) // S)
    xf = x_nhwc.astype(jnp.float32)
    xp = jnp.pad(xf, ((0, 0), (P, Hq * S - H - P), (P, Wq * S - W - P), (0, 0)))
    if S == 1:
        # No phase split needed: pure (free) expand_dims, no transpose copy.
        xps = xp[:, None, None]
    else:
        # Batch-leading phase split: xps[n,a,b,i,j,c] == xp[n, i*S+a, j*S+b, c],
        # so each grid step DMAs one contiguous per-image region.
        xps = xp.reshape(N, Hq, S, Wq, S, Cin).transpose(0, 2, 4, 1, 3, 5)

    # TODO(synk): production-size feature maps need spatial tiling + a two-pass
    # InstanceNorm (f32 sum/sumsq pass, then normalize+ReLU pass) to fit v7x's
    # 64 MiB VMEM; this kernel keeps one per-image plane in VMEM per grid step,
    # which is right for these sizes.
    kern = functools.partial(_conv_in_relu_kernel, K=K, S=S, Ho=Ho, Wo=Wo, eps=eps)
    out = pl.pallas_call(
        kern,
        out_shape=jax.ShapeDtypeStruct((N, Ho * Wo, Cout_pad), jnp.float32),
        grid=(N, n_ct),
        in_specs=[
            pl.BlockSpec((1, S, S, Hq, Wq, Cin), lambda n, j: (n, 0, 0, 0, 0, 0)),
            pl.BlockSpec((KKC, CT), lambda n, j: (0, j)),
        ],
        out_specs=pl.BlockSpec((1, Ho * Wo, CT), lambda n, j: (n, 0, j)),
        scratch_shapes=[pltpu.VMEM((Ho * Wo, KKC), jnp.float32)],
        compiler_params=pltpu.CompilerParams(
            dimension_semantics=("parallel", "parallel")),
    )(xps, w2)
    return out.reshape(N, Ho, Wo, Cout_pad)[..., :Cout]


# ----------------------------------------------------------------------------
# Bilinear 2x upsample (align_corners=False), Pallas kernel
# ----------------------------------------------------------------------------
def _upsample2x_kernel(x_ref, o_ref):
    """x_ref: (1, H+2, W+2, C) edge-replicated input.
    o_ref: (1, H, 2, W, 2*C) with out[0, i, hp, j, wp*C + c] == up[2i+hp, 2j+wp, c].
    """
    H = o_ref.shape[1]
    W = o_ref.shape[3]
    C = x_ref.shape[3]
    xp = x_ref[0]                                        # (H+2, W+2, C)
    top, mid, bot = xp[0:H, :, :], xp[1:H + 1, :, :], xp[2:H + 2, :, :]
    rows = (0.25 * top + 0.75 * mid,                     # output rows 2i
            0.75 * mid + 0.25 * bot)                     # output rows 2i+1
    for hp in range(2):
        r = rows[hp]                                     # (H, W+2, C)
        left, cen, right = r[:, 0:W, :], r[:, 1:W + 1, :], r[:, 2:W + 2, :]
        o_ref[0, :, hp, :, 0:C] = 0.25 * left + 0.75 * cen        # cols 2j
        o_ref[0, :, hp, :, C:2 * C] = 0.75 * cen + 0.25 * right   # cols 2j+1


def bilinear_upsample2x(x_nhwc):
    """nn.Upsample(scale_factor=2, mode='bilinear') (align_corners=False), NHWC."""
    # TODO(synk): fuse this 2-tap stencil into the conv kernel's input stage (or fold
    # it into the conv weights) to remove the HBM round trip of the 4x-sized tensor.
    N, H, W, C = x_nhwc.shape
    xp = jnp.pad(x_nhwc, ((0, 0), (1, 1), (1, 1), (0, 0)), mode="edge")
    u = pl.pallas_call(
        _upsample2x_kernel,
        out_shape=jax.ShapeDtypeStruct((N, H, 2, W, 2 * C), x_nhwc.dtype),
        grid=(N,),
        in_specs=[pl.BlockSpec((1, H + 2, W + 2, C), lambda n: (n, 0, 0, 0))],
        out_specs=pl.BlockSpec((1, H, 2, W, 2 * C), lambda n: (n, 0, 0, 0, 0)),
        compiler_params=pltpu.CompilerParams(
            dimension_semantics=("parallel",)),
    )(xp)
    # (N, H, 2, W, 2, C) -> (N, 2H, 2W, C) is a free row-major reshape.
    return u.reshape(N, 2 * H, 2 * W, C)


# ----------------------------------------------------------------------------
# CBR module (functional)
# ----------------------------------------------------------------------------
def init_cbr_params(key, in_ch, out_ch, kernel):
    """Conv2d-style init; weight stored as (K*K, Cin, Cout)."""
    kw, kb = jax.random.split(key)
    fan_in = in_ch * kernel * kernel
    bound = 1.0 / math.sqrt(fan_in)
    w = jax.random.uniform(kw, (kernel * kernel, in_ch, out_ch), jnp.float32,
                           -bound, bound)
    b = jax.random.uniform(kb, (out_ch,), jnp.float32, -bound, bound)
    return w, b


def cbr_forward(params, x_nchw, *, kernel, stride, pad, up=False, eps=1e-5):
    """CBR.forward: [Upsample(2x bilinear) ->] Conv2d -> InstanceNorm2d -> ReLU.

    x_nchw: (N, C, H, W) float32; returns NCHW float32.
    The conv bias `params[1]` is kept for module parity but not applied: it is
    exactly cancelled by InstanceNorm2d(affine=False)'s mean subtraction.
    """
    w, _b = params
    x = jnp.transpose(x_nchw, (0, 2, 3, 1)).astype(jnp.float32)  # NCHW -> NHWC
    if up:
        x = bilinear_upsample2x(x)
    y = conv_in_relu(x, w, kernel=kernel, stride=stride, pad=pad, eps=eps)
    return jnp.transpose(y, (0, 3, 1, 2))                        # NHWC -> NCHW


# ----------------------------------------------------------------------------
# Pure-JAX reference (for correctness checks only)
# ----------------------------------------------------------------------------
def _ref_upsample2x(x_nhwc):
    def interp(arr, axis, size):
        i = jnp.arange(2 * size, dtype=jnp.float32)
        src = (i + 0.5) * 0.5 - 0.5
        lo = jnp.floor(src)
        frac = src - lo
        lo_i = jnp.clip(lo, 0, size - 1).astype(jnp.int32)
        hi_i = jnp.clip(lo + 1, 0, size - 1).astype(jnp.int32)
        a = jnp.take(arr, lo_i, axis=axis)
        b = jnp.take(arr, hi_i, axis=axis)
        shape = [1] * arr.ndim
        shape[axis] = 2 * size
        frac = frac.reshape(shape).astype(arr.dtype)
        return a * (1.0 - frac) + b * frac

    _, H, W, _ = x_nhwc.shape
    return interp(interp(x_nhwc, 1, H), 2, W)


def _ref_cbr(params, x_nchw, *, kernel, stride, pad, up, eps=1e-5):
    w, b = params
    x = jnp.transpose(x_nchw, (0, 2, 3, 1)).astype(jnp.float32)
    if up:
        x = _ref_upsample2x(x)
    # Mirror the kernel's bf16 MXU operands (accumulation is f32 in both).
    x = x.astype(jnp.bfloat16).astype(jnp.float32)
    K = kernel
    w_hwio = (w.reshape(K, K, w.shape[1], w.shape[2])
              .astype(jnp.bfloat16).astype(jnp.float32))
    y = lax.conv_general_dilated(
        x, w_hwio, window_strides=(stride, stride),
        padding=[(pad, pad), (pad, pad)],
        dimension_numbers=("NHWC", "HWIO", "NHWC"))
    y = y + b   # bias kept in the reference: it is a no-op through InstanceNorm
    mean = jnp.mean(y, axis=(1, 2), keepdims=True)
    var = jnp.mean((y - mean) ** 2, axis=(1, 2), keepdims=True)
    y = jnp.maximum((y - mean) / jnp.sqrt(var + eps), 0.0)
    return jnp.transpose(y, (0, 3, 1, 2))


if __name__ == "__main__":
    key = jax.random.PRNGKey(0)
    kx, k1, k2, k3 = jax.random.split(key, 4)
    x = jax.random.normal(kx, (2, 4, 16, 16), jnp.float32)   # NCHW

    # Standalone upsample kernel check (pure f32, tight tolerance).
    x_nhwc = jnp.transpose(x, (0, 2, 3, 1))
    u = jax.block_until_ready(jax.jit(bilinear_upsample2x)(x_nhwc))
    u_ref = _ref_upsample2x(x_nhwc)
    assert u.shape == (2, 32, 32, 4)
    assert float(jnp.max(jnp.abs(u - u_ref))) < 1e-5

    cases = [
        # (in_ch, out_ch, K, stride, pad, up, expected output shape, param key)
        (4, 32, 3, 1, 1, False, (2, 32, 16, 16), k1),  # CBR(4, 32, 3, 1, 1)
        (4, 32, 3, 1, 1, True,  (2, 32, 32, 32), k2),  # CBR(4, 32, 3, 1, 1, up=True)
        (4, 32, 4, 2, 1, False, (2, 32, 8, 8),   k3),  # CBR(4, 32, 4, 2, 1) downsample
    ]
    for in_ch, out_ch, K, S, P, up, exp_shape, kparam in cases:
        params = init_cbr_params(kparam, in_ch, out_ch, K)
        fwd = jax.jit(functools.partial(cbr_forward, kernel=K, stride=S, pad=P, up=up))
        y = jax.block_until_ready(fwd(params, x))
        assert y.shape == exp_shape, (y.shape, exp_shape)
        assert y.dtype == jnp.float32
        y_ref = _ref_cbr(params, x, kernel=K, stride=S, pad=P, up=up)
        # Tolerance covers bf16 MXU operands (both sides bf16-rounded); real
        # implementation bugs show up as errors >= ~0.1.
        err = float(jnp.max(jnp.abs(y - y_ref)))
        assert err < 1e-2, f"max abs err {err} (K={K} S={S} P={P} up={up})"
        assert float(jnp.min(y)) >= 0.0            # ReLU
        assert bool(jnp.all(jnp.isfinite(y)))

    print("KERNEL_OK")
</pallas_src>

<mosaic_0001>
module attributes {stable_mosaic.version = 11 : i64} {
  func.func @_upsample2x_kernel(%arg0: i32, %arg1: memref<1x18x18x4xf32, #tpu.memory_space<vmem>>, %arg2: memref<1x16x2x16x8xf32, #tpu.memory_space<vmem>>) attributes {dimension_semantics = [#tpu.dimension_semantics<parallel>], iteration_bounds = array<i64: 2>, scalar_prefetch = 0 : i64, scratch_operands = 0 : i64, tpu.core_type = #tpu.core_type<tc>, window_params = [{transform_indices = @transform_0, window_bounds = array<i64: 1, 18, 18, 4>}, {transform_indices = @transform_1, window_bounds = array<i64: 1, 16, 2, 16, 8>}]} {
    %c0 = arith.constant 0 : index
    %c0_0 = arith.constant 0 : index
    %c0_1 = arith.constant 0 : index
    %c0_2 = arith.constant 0 : index
    %0 = vector.load %arg1[%c0, %c0_0, %c0_1, %c0_2] : memref<1x18x18x4xf32, #tpu.memory_space<vmem>>, vector<1x18x18x4xf32>
    %1 = vector.shape_cast %0 : vector<1x18x18x4xf32> to vector<18x18x4xf32>
    %2 = vector.extract_strided_slice %1 {offsets = [0, 0, 0], sizes = [16, 18, 4], strides = [1, 1, 1]} : vector<18x18x4xf32> to vector<16x18x4xf32>
    %3 = vector.extract_strided_slice %1 {offsets = [1, 0, 0], sizes = [16, 18, 4], strides = [1, 1, 1]} : vector<18x18x4xf32> to vector<16x18x4xf32>
    %4 = vector.extract_strided_slice %1 {offsets = [2, 0, 0], sizes = [16, 18, 4], strides = [1, 1, 1]} : vector<18x18x4xf32> to vector<16x18x4xf32>
    %cst = arith.constant 2.500000e-01 : f32
    %5 = vector.broadcast %cst : f32 to vector<16x18x4xf32>
    %6 = arith.mulf %5, %2 : vector<16x18x4xf32>
    %cst_3 = arith.constant 7.500000e-01 : f32
    %7 = vector.broadcast %cst_3 : f32 to vector<16x18x4xf32>
    %8 = arith.mulf %7, %3 : vector<16x18x4xf32>
    %9 = arith.addf %6, %8 : vector<16x18x4xf32>
    %cst_4 = arith.constant 7.500000e-01 : f32
    %10 = vector.broadcast %cst_4 : f32 to vector<16x18x4xf32>
    %11 = arith.mulf %10, %3 : vector<16x18x4xf32>
    %cst_5 = arith.constant 2.500000e-01 : f32
    %12 = vector.broadcast %cst_5 : f32 to vector<16x18x4xf32>
    %13 = arith.mulf %12, %4 : vector<16x18x4xf32>
    %14 = arith.addf %11, %13 : vector<16x18x4xf32>
    %15 = vector.extract_strided_slice %9 {offsets = [0, 0, 0], sizes = [16, 16, 4], strides = [1, 1, 1]} : vector<16x18x4xf32> to vector<16x16x4xf32>
    %16 = vector.extract_strided_slice %9 {offsets = [0, 1, 0], sizes = [16, 16, 4], strides = [1, 1, 1]} : vector<16x18x4xf32> to vector<16x16x4xf32>
    %17 = vector.extract_strided_slice %9 {offsets = [0, 2, 0], sizes = [16, 16, 4], strides = [1, 1, 1]} : vector<16x18x4xf32> to vector<16x16x4xf32>
    %cst_6 = arith.constant 2.500000e-01 : f32
    %18 = vector.broadcast %cst_6 : f32 to vector<16x16x4xf32>
    %19 = arith.mulf %18, %15 : vector<16x16x4xf32>
    %cst_7 = arith.constant 7.500000e-01 : f32
    %20 = vector.broadcast %cst_7 : f32 to vector<16x16x4xf32>
    %21 = arith.mulf %20, %16 : vector<16x16x4xf32>
    %22 = arith.addf %19, %21 : vector<16x16x4xf32>
    %c0_8 = arith.constant 0 : index
    %c0_9 = arith.constant 0 : index
    %c0_10 = arith.constant 0 : index
    %c0_11 = arith.constant 0 : index
    %c0_12 = arith.constant 0 : index
    %23 = vector.load %arg2[%c0_8, %c0_9, %c0_10, %c0_11, %c0_12] : memref<1x16x2x16x8xf32, #tpu.memory_space<vmem>>, vector<1x16x1x16x4xf32>
    %24 = vector.shape_cast %23 : vector<1x16x1x16x4xf32> to vector<16x16x4xf32>
    %25 = vector.shape_cast %22 : vector<16x16x4xf32> to vector<1x16x1x16x4xf32>
    tpu.vector_store %arg2[%c0_8, %c0_9, %c0_10, %c0_11, %c0_12], %25 {strides = array<i32>} : memref<1x16x2x16x8xf32, #tpu.memory_space<vmem>>, vector<1x16x1x16x4xf32>,
    %cst_13 = arith.constant 7.500000e-01 : f32
    %26 = vector.broadcast %cst_13 : f32 to vector<16x16x4xf32>
    %27 = arith.mulf %26, %16 : vector<16x16x4xf32>
    %cst_14 = arith.constant 2.500000e-01 : f32
    %28 = vector.broadcast %cst_14 : f32 to vector<16x16x4xf32>
    %29 = arith.mulf %28, %17 : vector<16x16x4xf32>
    %30 = arith.addf %27, %29 : vector<16x16x4xf32>
    %c0_15 = arith.constant 0 : index
    %c0_16 = arith.constant 0 : index
    %c0_17 = arith.constant 0 : index
    %c0_18 = arith.constant 0 : index
    %c4 = arith.constant 4 : index
    %31 = vector.load %arg2[%c0_15, %c0_16, %c0_17, %c0_18, %c4] : memref<1x16x2x16x8xf32, #tpu.memory_space<vmem>>, vector<1x16x1x16x4xf32>
    %32 = vector.shape_cast %31 : vector<1x16x1x16x4xf32> to vector<16x16x4xf32>
    %33 = vector.shape_cast %30 : vector<16x16x4xf32> to vector<1x16x1x16x4xf32>
    tpu.vector_store %arg2[%c0_15, %c0_16, %c0_17, %c0_18, %c4], %33 {strides = array<i32>} : memref<1x16x2x16x8xf32, #tpu.memory_space<vmem>>, vector<1x16x1x16x4xf32>,
    %34 = vector.extract_strided_slice %14 {offsets = [0, 0, 0], sizes = [16, 16, 4], strides = [1, 1, 1]} : vector<16x18x4xf32> to vector<16x16x4xf32>
    %35 = vector.extract_strided_slice %14 {offsets = [0, 1, 0], sizes = [16, 16, 4], strides = [1, 1, 1]} : vector<16x18x4xf32> to vector<16x16x4xf32>
    %36 = vector.extract_strided_slice %14 {offsets = [0, 2, 0], sizes = [16, 16, 4], strides = [1, 1, 1]} : vector<16x18x4xf32> to vector<16x16x4xf32>
    %cst_19 = arith.constant 2.500000e-01 : f32
    %37 = vector.broadcast %cst_19 : f32 to vector<16x16x4xf32>
    %38 = arith.mulf %37, %34 : vector<16x16x4xf32>
    %cst_20 = arith.constant 7.500000e-01 : f32
    %39 = vector.broadcast %cst_20 : f32 to vector<16x16x4xf32>
    %40 = arith.mulf %39, %35 : vector<16x16x4xf32>
    %41 = arith.addf %38, %40 : vector<16x16x4xf32>
    %c0_21 = arith.constant 0 : index
    %c0_22 = arith.constant 0 : index
    %c1 = arith.constant 1 : index
    %c0_23 = arith.constant 0 : index
    %c0_24 = arith.constant 0 : index
    %42 = vector.load %arg2[%c0_21, %c0_22, %c1, %c0_23, %c0_24] : memref<1x16x2x16x8xf32, #tpu.memory_space<vmem>>, vector<1x16x1x16x4xf32>
    %43 = vector.shape_cast %42 : vector<1x16x1x16x4xf32> to vector<16x16x4xf32>
    %44 = vector.shape_cast %41 : vector<16x16x4xf32> to vector<1x16x1x16x4xf32>
    tpu.vector_store %arg2[%c0_21, %c0_22, %c1, %c0_23, %c0_24], %44 {strides = array<i32>} : memref<1x16x2x16x8xf32, #tpu.memory_space<vmem>>, vector<1x16x1x16x4xf32>,
    %cst_25 = arith.constant 7.500000e-01 : f32
    %45 = vector.broadcast %cst_25 : f32 to vector<16x16x4xf32>
    %46 = arith.mulf %45, %35 : vector<16x16x4xf32>
    %cst_26 = arith.constant 2.500000e-01 : f32
    %47 = vector.broadcast %cst_26 : f32 to vector<16x16x4xf32>
    %48 = arith.mulf %47, %36 : vector<16x16x4xf32>
    %49 = arith.addf %46, %48 : vector<16x16x4xf32>
    %c0_27 = arith.constant 0 : index
    %c0_28 = arith.constant 0 : index
    %c1_29 = arith.constant 1 : index
    %c0_30 = arith.constant 0 : index
    %c4_31 = arith.constant 4 : index
    %50 = vector.load %arg2[%c0_27, %c0_28, %c1_29, %c0_30, %c4_31] : memref<1x16x2x16x8xf32, #tpu.memory_space<vmem>>, vector<1x16x1x16x4xf32>
    %51 = vector.shape_cast %50 : vector<1x16x1x16x4xf32> to vector<16x16x4xf32>
    %52 = vector.shape_cast %49 : vector<16x16x4xf32> to vector<1x16x1x16x4xf32>
    tpu.vector_store %arg2[%c0_27, %c0_28, %c1_29, %c0_30, %c4_31], %52 {strides = array<i32>} : memref<1x16x2x16x8xf32, #tpu.memory_space<vmem>>, vector<1x16x1x16x4xf32>,
    return
  }
  func.func @transform_0(%arg0: i32) -> (i32, i32, i32, i32) {
    %c0_i32 = arith.constant 0 : i32
    %c0_i32_0 = arith.constant 0 : i32
    %c0_i32_1 = arith.constant 0 : i32
    %c0_i32_2 = arith.constant 0 : i32
    return %arg0, %c0_i32, %c0_i32_0, %c0_i32_1 : i32, i32, i32, i32
  }
  func.func @transform_1(%arg0: i32) -> (i32, i32, i32, i32, i32) {
    %c0_i32 = arith.constant 0 : i32
    %c0_i32_0 = arith.constant 0 : i32
    %c0_i32_1 = arith.constant 0 : i32
    %c0_i32_2 = arith.constant 0 : i32
    %c0_i32_3 = arith.constant 0 : i32
    return %arg0, %c0_i32, %c0_i32_0, %c0_i32_1, %c0_i32_2 : i32, i32, i32, i32, i32
  }
}

</mosaic_0001>

<bundles_post_ra>
// kernel: bilinear_upsample2x.1
= control target key start
LH: loop header
LB: loop body
LE: loop exit
PB: predicated region body
PF: predicated region fallthrough
CT: control target
= control target key end

     0   :  { %s2120_s6 = smov 0   ;;  %s3452_s0 = inlined_call_operand.vmem [shape: f32[2,18,18,4], index: 0, kind: input, shape index: {}]   ;;  %s3453_s1 = inlined_call_operand.vmem [shape: f32[2,16,2,16,8], index: 1, kind: output, shape index: {}]  }
   0x1 LB: > { %s1998_s7 = sadd.s32 4294967295, %s2107_s6   ;;  %p2002_p0 = scmp.ge.s32.totalorder %s2107_s6, 1  ;;  %s2107_s6 = sphi %s2120_s6, %s11_s6  }
   0x2   : > { %p87_p1 = scmp.lt.s32.totalorder %s2107_s6, 3 }
   0x4   : > { %p88_p2 = pnand %p2002_p0, %p87_p1 }
   0x6   : > { %91 = sbr.rel (%p88_p2) target bundleno = 357 (0x165), region = 24 }
   0xd   : > { %p107_p3 = scmp.lt.s32.totalorder %s1998_s7, 1  ;;  %vm497_vm0 = vcmask 1046528   ;;  %s2109_s12 = smov 4   ;;  %vm642_vm1 = vcmask 31744   ;;  %vm1111_vm2 = vcmask 57376   ;;  %vm1107_vm3 = vcmask 64545  }
   0xe   : > { %vm1109_vm4 = vcmask 64544  }
   0xf   : > { %s3728_s7 = smov (!%p107_p3, %s1998_s7), 1 }
  0x10   : > { %s2089_s8 = smul.u32 432, %s3728_s7  ;;  %s2088_s13 = sshll.u32 %s3728_s7, 9 }
  0x11   : > { %s2795_s16 = scalar_lea.vmem %s3453_s1, %s2088_s13 }
  0x12   : > { %s2134_s11 = scalar_lea.vmem %s3452_s0, %s2089_s8 }
  0x13   : > { %v125_v0 = vld [vmem:[%s2134_s11 + $0x40] sm:$0x3]  ;;  %v128_v1 = vld [vmem:[%s2134_s11 + $0x58] sm:$0x3]  ;;  %v2139_v2 = vld [vmem:[%s2134_s11 + $0x70] sm:$0x3] }
  0x14   : > { %v179_v3 = vmul.f32 0.25, %v125_v0  ;;  %v2141_v4 = vmul.f32 0.25, %v128_v1  ;;  %v2144_v5 = vmul.f32 0.25, %v2139_v2  ;;  %v2146_v6 = vmul.f32 0.75, %v125_v0  ;;  %v119_v7 = vld [vmem:[%s2134_s11 + $0x10] sm:$0x3] }
  0x15   : > { %v227_v8 = vmul.f32 0.75, %v128_v1  ;;  %v122_v9 = vld [vmem:[%s2134_s11 + $0x28] sm:$0x3]  ;;  %v173_v10 = vmul.f32 0.25, %v119_v7  ;;  %v117_v11 = vld [vmem:[%s2134_s11] sm:$0xff]  ;;  %v120_v15 = vld [vmem:[%s2134_s11 + $0x18] sm:$0xff] }
  0x16   : > { %v118_v12 = vld [vmem:[%s2134_s11 + $0x8] sm:$0xff]  ;;  %v176_v13 = vmul.f32 0.25, %v122_v9  ;;  %v221_v14 = vmul.f32 0.75, %v122_v9  ;;  %v121_v16 = vld [vmem:[%s2134_s11 + $0x20] sm:$0xff]  ;;  %v171_v17 = vmul.f32 0.25, %v117_v11  ;;  %v2157_v21 = vmul.f32 0.75, %v120_v15 }
  0x17   : > { %v172_v18 = vmul.f32 0.25, %v118_v12  ;;  %v275_v19 = vadd.f32 %v227_v8, %v179_v3  ;;  %v2155_v20 = vadd.f32 %v227_v8, %v2144_v5  ;;  %v2159_v22 = vmul.f32 0.75, %v121_v16  ;;  %v123_v39 = vld [vmem:[%s2134_s11 + $0x30] sm:$0xff]  ;;  %v124_v44 = vld [vmem:[%s2134_s11 + $0x38] sm:$0xff]  ;;  %v126_v58 = vld [vmem:[%s2134_s11 + $0x48] sm:$0xff] }
  0x18   : > { %v269_v23 = vadd.f32 %v221_v14, %v173_v10  ;;  %v2161_v24 = vadd.f32 %v221_v14, %v179_v3  ;;  %v272_v25 = vadd.f32 %v2146_v6, %v176_v13  ;;  %v174_v26 = vmul.f32 0.25, %v120_v15  ;;  %v127_v57 = vld [vmem:[%s2134_s11 + $0x50] sm:$0xff]  ;;  %v2207_v7 = vld [vmem:[%s2134_s11 + $0x60] sm:$0xff]  ;;  %v130_v11 = vld [vmem:[%s2134_s11 + $0x68] sm:$0xff] }
  0x19   : > { %v2164_v27 = vmul.f32 0.75, %v275_v19  ;;  %v2166_v28 = vmul.f32 0.25, %v275_v19  ;;  %v267_v29 = vadd.f32 %v2157_v21, %v171_v17  ;;  %v268_v30 = vadd.f32 %v2159_v22, %v172_v18 }
  0x1a   : > { %v403_v31 = vmul.f32 0.75, %v269_v23  ;;  %v675_v32 = vmul.f32 0.25, %v269_v23  ;;  %v2170_v33 = vmul.f32 0.75, %v272_v25  ;;  %v2172_v34 = vmul.f32 0.25, %v272_v25 }
  0x1b   : > { %v752_v35 = vrot.slane %v2166_v28, 1  ;;  %v511_v36 = vrot.slane %v2164_v27, 1  ;;  %v2176_v37 = vmul.f32 0.25, %v267_v29  ;;  %v2178_v38 = vmul.f32 0.25, %v268_v30 }
  0x1c   : > { %v742_v40 = vrot.slane %v675_v32, 1  ;;  %v501_v41 = vrot.slane %v403_v31, 1  ;;  %v506_v42 = vrot.slane %v2170_v33, 1  ;;  %v747_v43 = vrot.slane %v2172_v34, 1 }
  0x1d   : > { %3535 = vst [vmem:[#allocation2_spill] sm:$0xff] %v2176_v37  ;;  %v875_v45 = vadd.f32 %v752_v35, %v2164_v27  ;;  %v401_v46 = vmul.f32 0.75, %v267_v29  ;;  %v739_v47 = vrot.slane %v2176_v37, 1  ;;  %v740_v48 = vrot.slane %v2178_v38, 1  ;;  %v157_v37 = vld [vmem:[%s2134_s11 + $0x140] sm:$0xff] }
  0x1e   : > { %v869_v49 = vadd.f32 %v742_v40, %v403_v31  ;;  %v872_v50 = vadd.f32 %v747_v43, %v2170_v33  ;;  %v175_v51 = vmul.f32 0.25, %v121_v16  ;;  %v2190_v52 = vmul.f32 0.75, %v123_v39 }
  0x1f   : > { %979 = vrot.lane.b32.xlu0 %v875_v45, %s2109_s12  ;;  %v498_v53 = vrot.slane %v401_v46, 1  ;;  %v741_v54 = vsel %vm497_vm0, %v739_v47, %v740_v48  ;;  %v2194_v55 = vmul.f32 0.75, %v124_v44  ;;  %v402_v56 = vmul.f32 0.75, %v268_v30 }
  0x20   : > { %967 = vrot.lane.b32.xlu1 %v869_v49, %s2109_s12  ;;  %v867_v59 = vadd.f32 %v741_v54, %v401_v46  ;;  %v270_v60 = vadd.f32 %v2190_v52, %v174_v26  ;;  %v743_v61 = vsel %vm497_vm0, %v740_v48, %v742_v40  ;;  %v2201_v62 = vmul.f32 0.25, %v124_v44 }
  0x21   : > { %v271_v63 = vadd.f32 %v2194_v55, %v175_v51  ;;  %v499_v0 = vrot.slane %v402_v56, 1  ;;  %v868_v1 = vadd.f32 %v743_v61, %v402_v56  ;;  %v2204_v3 = vmul.f32 0.25, %v127_v57  ;;  %v133_v56 = vld [vmem:[%s2134_s11 + $0x80] sm:$0xff] }
  0x22   : > { %v2209_v8 = vmul.f32 0.25, %v270_v60  ;;  %v404_v9 = vmul.f32 0.75, %v270_v60  ;;  %v2211_v10 = vmul.f32 0.75, %v127_v57  ;;  %v2214_v12 = vmul.f32 0.25, %v126_v58  ;;  %v134_v57 = vld [vmem:[%s2134_s11 + $0x88] sm:$0x3] }
  0x23   : > { %963 = vrot.lane.b32.xlu0 %v867_v59, %s2109_s12  ;;  %v2217_v13 = vmul.f32 0.25, %v271_v63  ;;  %v2220_v14 = vsel %vm497_vm0, %v498_v53, %v499_v0  ;;  %v2223_v15 = vsel %vm497_vm0, %v499_v0, %v501_v41  ;;  %v405_v16 = vmul.f32 0.75, %v271_v63 }
  0x24   : > { %3536 = vst [vmem:[#allocation3_spill] sm:$0xff] %v2209_v8  ;;  %3538 = vst [vmem:[#allocation5_spill] sm:$0xff] %v2220_v14  ;;  %973 = vrot.lane.b32.xlu1 %v872_v50, %s2109_s12  ;;  %v503_v17 = vrot.slane %v404_v9, 1  ;;  %v744_v18 = vrot.slane %v2209_v8, 1  ;;  %v274_v19 = vadd.f32 %v2211_v10, %v2201_v62  ;;  %v2230_v23 = vmul.f32 0.75, %v2207_v7 }
  0x25   : > { %3537 = vst [vmem:[#allocation4_spill] sm:$0xff] %v2217_v13  ;;  %v745_v25 = vrot.slane %v2217_v13, 1  ;;  %v504_v26 = vrot.slane %v405_v16, 1  ;;  %v2233_v29 = vmul.f32 0.75, %v130_v11  ;;  %v2235_v30 = vmul.f32 0.25, %v123_v39 }
  0x26   : > { %v2237_v31 = vmul.f32 0.25, %v274_v19  ;;  %v408_v32 = vmul.f32 0.75, %v274_v19  ;;  %v276_v33 = vadd.f32 %v2230_v23, %v2214_v12  ;;  %v2241_v34 = vmul.f32 0.75, %v126_v58 }
  0x27   : > { %v746_v40 = vsel %vm497_vm0, %v744_v18, %v745_v25  ;;  %965 = vrot.lane.b32.xlu0 %v868_v1, %s2109_s12  ;;  %v2246_v41 = vsel %vm497_vm0, %v503_v17, %v504_v26  ;;  %v2249_v39 = vsel %vm497_vm0, %v504_v26, %v506_v42  ;;  %v748_v44 = vsel %vm497_vm0, %v745_v25, %v747_v43 }
  0x28   : > { %3539 = vst [vmem:[#allocation6_spill] sm:$0xff] %v2246_v41  ;;  %3540 = vst [vmem:[#allocation7_spill] sm:$0xff] %v2249_v39  ;;  %v870_v45 = vadd.f32 %v746_v40, %v404_v9  ;;  %v509_v46 = vrot.slane %v408_v32, 1  ;;  %v750_v47 = vrot.slane %v2237_v31, 1  ;;  %v871_v48 = vadd.f32 %v748_v44, %v405_v16 }
  0x29   : > { %v277_v49 = vadd.f32 %v2233_v29, %v2204_v3  ;;  %v2255_v50 = vmul.f32 0.25, %v276_v33  ;;  %v410_v51 = vmul.f32 0.75, %v276_v33  ;;  %v273_v53 = vadd.f32 %v2241_v34, %v2235_v30 }
  0x2a   : > { %969 = vrot.lane.b32.xlu1 %v870_v45, %s2109_s12  ;;  %v2263_v42 = vsel %vm497_vm0, %v509_v46, %v511_v36  ;;  %v753_v43 = vsel %vm497_vm0, %v750_v47, %v752_v35  ;;  %v2269_v54 = vmul.f32 0.75, %v2139_v2  ;;  %v2273_v58 = vmul.f32 0.25, %v130_v11 }
  0x2b   : > { %3541 = vst [vmem:[#allocation8_spill] sm:$0xff] %v2255_v50  ;;  %v874_v59 = vadd.f32 %v753_v43, %v408_v32  ;;  %971 = vrot.lane.b32.xlu0 %v871_v48, %s2109_s12  ;;  %v2276_v60 = vmul.f32 0.25, %v277_v49  ;;  %v513_v27 = vrot.slane %v410_v51, 1  ;;  %v754_v36 = vrot.slane %v2255_v50, 1  ;;  %v132_v48 = vld [vmem:[%s2134_s11 + $0x78] sm:$0xff] }
  0x2c   : > { %3542 = vst [vmem:[#allocation9_spill] sm:$0xff] %v2269_v54  ;;  %v373_v61 = vmul.f32 0.25, %v273_v53  ;;  %v407_v63 = vmul.f32 0.75, %v273_v53  ;;  %v278_v28 = vadd.f32 %v2269_v54, %v2141_v4  ;;  %v411_v35 = vmul.f32 0.75, %v277_v49  ;;  %v158_v54 = vld [vmem:[%s2134_s11 + $0x148] sm:$0x3] }
  0x2d   : > { %3543 = vst [vmem:[#allocation10_spill] sm:$0xff] %v2276_v60  ;;  %v755_v2 = vrot.slane %v2276_v60, 1  ;;  %v2282_v0 = vmul.f32 0.25, %v133_v56  ;;  %v2284_v1 = vmul.f32 0.75, %v133_v56  ;;  %v2286_v9 = vmul.f32 0.75, %v134_v57 }
  0x2e   : > { %977 = vrot.lane.b32.xlu1 %v874_v59, %s2109_s12  ;;  %v508_v11 = vrot.slane %v407_v63, 1  ;;  %v749_v16 = vrot.slane %v373_v61, 1  ;;  %v412_v17 = vmul.f32 0.75, %v278_v28  ;;  %v678_v18 = vmul.f32 0.25, %v278_v28 }
  0x2f   : > { %3544 = vst [vmem:[#allocation11_spill] sm:$0xff] %v2284_v1  ;;  %3545 = vst [vmem:[#allocation12_spill] sm:$0xff] %v2286_v9  ;;  %v756_v19 = vsel %vm497_vm0, %v754_v36, %v755_v2  ;;  %v514_v25 = vrot.slane %v411_v35, 1  ;;  %v280_v26 = vadd.f32 %v2284_v1, %v2273_v58  ;;  %v281_v32 = vadd.f32 %v2286_v9, %v2144_v5  ;;  %v146_v9 = vld [vmem:[%s2134_s11 + $0xe8] sm:$0x3] }
  0x30   : > { %v876_v33 = vadd.f32 %v756_v19, %v410_v51  ;;  %v510_v40 = vsel %vm497_vm0, %v508_v11, %v509_v46  ;;  %v751_v44 = vsel %vm497_vm0, %v749_v16, %v750_v47  ;;  %v516_v45 = vrot.slane %v412_v17, 1  ;;  %v2307_v46 = vld [vmem:[%s2134_s11 + $0x90] sm:$0xff]  ;;  %v136_v47 = vld [vmem:[%s2134_s11 + $0x98] sm:$0xff] }
  0x31   : > { %v2297_v49 = vadd.f32 %v510_v40, %v373_v61  ;;  %v873_v53 = vadd.f32 %v751_v44, %v407_v63  ;;  %v757_v43 = vrot.slane %v678_v18, 1  ;;  %v2300_v56 = vsel %vm497_vm0, %v513_v27, %v514_v25 }
  0x32   : > { %3546 = vst [vmem:[#allocation13_spill] sm:$0xff] %v2300_v56  ;;  %981 = vrot.lane.b32.xlu1 %v876_v33, %s2109_s12  ;;  %v2304_v59 = vsel %vm497_vm0, %v514_v25, %v516_v45  ;;  %v378_v5 = vmul.f32 0.25, %v280_v26  ;;  %v414_v51 = vmul.f32 0.75, %v280_v26  ;;  %v679_v36 = vmul.f32 0.25, %v281_v32 }
  0x33   : > { %3547 = vst [vmem:[#allocation14_spill] sm:$0xff] %v2304_v59  ;;  %975 = vrot.lane.b32.xlu0 %v873_v53, %s2109_s12  ;;  %v878_v61 = vadd.f32 %v757_v43, %v412_v17  ;;  %v758_v63 = vsel %vm497_vm0, %v755_v2, %v757_v43  ;;  %v2313_v27 = vmul.f32 0.25, %v2207_v7  ;;  %v2315_v28 = vmul.f32 0.75, %v132_v48  ;;  %v137_v2 = vld [vmem:[%s2134_s11 + $0xa0] sm:$0x3]  ;;  %647 = vst.msk [vmem:[%s2795_s16 + $0x40] sm:$0xff] %vm642_vm1, %v2297_v49 }
  0x34   : > { %v877_v11 = vadd.f32 %v758_v63, %v411_v35  ;;  %v519_v16 = vrot.slane %v414_v51, 1  ;;  %v760_v18 = vrot.slane %v378_v5, 1  ;;  %v762_v19 = vrot.slane %v679_v36, 1 }
  0x35   : > { %3548 = vst [vmem:[#allocation15_spill] sm:$0xff] %v2315_v28  ;;  %v279_v25 = vadd.f32 %v2315_v28, %v2313_v27  ;;  %v2319_v26 = vmul.f32 0.25, %v132_v48  ;;  %v2322_v33 = vmul.f32 0.75, %v2307_v46  ;;  %v2324_v17 = vmul.f32 0.75, %v136_v47 }
  0x36   : > { %985 = vrot.lane.b32.xlu1 %v878_v61, %s2109_s12  ;;  %v763_v7 = vsel %vm497_vm0, %v760_v18, %v762_v19  ;;  %v415_v40 = vmul.f32 0.75, %v281_v32  ;;  %v2329_v35 = vmul.f32 0.25, %v134_v57  ;;  %v2331_v44 = vmul.f32 0.25, %v137_v2 }
  0x37   : > { %3549 = vst [vmem:[#allocation16_spill] sm:$0xff] %v2322_v33  ;;  %3550 = vst [vmem:[#allocation17_spill] sm:$0xff] %v2324_v17  ;;  %983 = vrot.lane.b32.xlu0 %v877_v11, %s2109_s12  ;;  %v880_v45 = vadd.f32 %v763_v7, %v414_v51  ;;  %v377_v48 = vmul.f32 0.25, %v279_v25  ;;  %v413_v53 = vmul.f32 0.75, %v279_v25  ;;  %v282_v43 = vadd.f32 %v2322_v33, %v2319_v26 }
  0x38   : > { %3551 = vst [vmem:[#allocation18_spill] sm:$0xff] %v2329_v35  ;;  %3552 = vst [vmem:[#allocation19_spill] sm:$0xff] %v2331_v44  ;;  %v283_v36 = vadd.f32 %v2324_v17, %v2282_v0  ;;  %v521_v63 = vrot.slane %v415_v40, 1  ;;  %v881_v61 = vadd.f32 %v762_v19, %v415_v40  ;;  %v2338_v32 = vmul.f32 0.75, %v137_v2  ;;  %v139_v17 = vld [vmem:[%s2134_s11 + $0xb0] sm:$0xff] }
  0x39   : > { %v518_v57 = vrot.slane %v413_v53, 1  ;;  %v759_v59 = vrot.slane %v377_v48, 1  ;;  %v2340_v60 = vmul.f32 0.25, %v282_v43  ;;  %v416_v11 = vmul.f32 0.75, %v282_v43  ;;  %v140_v43 = vld [vmem:[%s2134_s11 + $0xb8] sm:$0x3] }
  0x3a   : > { %3553 = vst [vmem:[#allocation20_spill] sm:$0xff] %v2338_v32  ;;  %989 = vrot.lane.b32.xlu1 %v880_v45, %s2109_s12  ;;  %v2343_v51 = vmul.f32 0.25, %v283_v36  ;;  %v522_v25 = vsel %vm497_vm0, %v519_v16, %v521_v63  ;;  %v284_v7 = vadd.f32 %v2338_v32, %v2329_v35  ;;  %v417_v56 = vmul.f32 0.75, %v283_v36 }
  0x3b   : > { %3554 = vst [vmem:[#allocation21_spill] sm:$0xff] %v2340_v60  ;;  %v520_v19 = vsel %vm497_vm0, %v518_v57, %v519_v16  ;;  %v761_v2 = vsel %vm497_vm0, %v759_v59, %v760_v18  ;;  %v523_v40 = vrot.slane %v416_v11, 1  ;;  %v764_v50 = vrot.slane %v2340_v60, 1  ;;  %v138_v59 = vld [vmem:[%s2134_s11 + $0xa8] sm:$0xff] }
  0x3c   : > { %3555 = vst [vmem:[#allocation22_spill] sm:$0xff] %v2343_v51  ;;  %v2353_v33 = vadd.f32 %v520_v19, %v377_v48  ;;  %v879_v45 = vadd.f32 %v761_v2, %v413_v53  ;;  %v765_v41 = vrot.slane %v2343_v51, 1  ;;  %v2356_v63 = vadd.f32 %v522_v25, %v378_v5 }
  0x3d   : > { %v418_v8 = vmul.f32 0.75, %v284_v7  ;;  %v680_v32 = vmul.f32 0.25, %v284_v7  ;;  %v524_v28 = vrot.slane %v417_v56, 1  ;;  %v2358_v36 = vmul.f32 0.25, %v136_v47 }
  0x3e   : > { %987 = vrot.lane.b32.xlu0 %v879_v45, %s2109_s12  ;;  %v766_v16 = vsel %vm497_vm0, %v764_v50, %v765_v41  ;;  %v2363_v18 = vmul.f32 0.25, %v139_v17  ;;  %v2365_v48 = vmul.f32 0.75, %v139_v17  ;;  %v2367_v53 = vmul.f32 0.75, %v140_v43  ;;  %v141_v17 = vld [vmem:[%s2134_s11 + $0xc0] sm:$0xff]  ;;  %v142_v45 = vld [vmem:[%s2134_s11 + $0xc8] sm:$0xff]  ;;  %651 = vst.msk [vmem:[%s2795_s16 + $0x80] sm:$0xff] %vm642_vm1, %v2353_v33 }
  0x3f   : > { %3556 = vst [vmem:[#allocation23_spill] sm:$0xff] %v2358_v36  ;;  %v882_v5 = vadd.f32 %v766_v16, %v416_v11  ;;  %v526_v57 = vrot.slane %v418_v8, 1  ;;  %v767_v25 = vrot.slane %v680_v32, 1  ;;  %v2370_v7 = vsel %vm497_vm0, %v523_v40, %v524_v28  ;;  %652 = vst.msk [vmem:[%s2795_s16 + $0x88] sm:$0xff] %vm642_vm1, %v2356_v63 }
  0x40   : > { %3557 = vst [vmem:[#allocation24_spill] sm:$0xff] %v2363_v18  ;;  %3558 = vst [vmem:[#allocation25_spill] sm:$0xff] %v2365_v48  ;;  %v286_v47 = vadd.f32 %v2365_v48, %v2358_v36  ;;  %v287_v19 = vadd.f32 %v2367_v53, %v2331_v44  ;;  %v2377_v50 = vmul.f32 0.25, %v2307_v46  ;;  %v2379_v2 = vmul.f32 0.75, %v138_v59 }
  0x41   : > { %3559 = vst [vmem:[#allocation26_spill] sm:$0xff] %v2367_v53  ;;  %3560 = vst [vmem:[#allocation27_spill] sm:$0xff] %v2370_v7  ;;  %993 = vrot.lane.b32.xlu1 %v882_v5, %s2109_s12  ;;  %v884_v11 = vadd.f32 %v767_v25, %v418_v8  ;;  %v2385_v32 = vsel %vm497_vm0, %v524_v28, %v526_v57  ;;  %v768_v40 = vsel %vm497_vm0, %v765_v41, %v767_v25 }
  0x42   : > { %3561 = vst [vmem:[#allocation28_spill] sm:$0xff] %v2377_v50  ;;  %3562 = vst [vmem:[#allocation29_spill] sm:$0xff] %v2379_v2  ;;  %v2388_v16 = vmul.f32 0.25, %v138_v59  ;;  %991 = vrot.lane.b32.xlu0 %v881_v61, %s2109_s12  ;;  %v883_v51 = vadd.f32 %v768_v40, %v417_v56  ;;  %v382_v7 = vmul.f32 0.25, %v286_v47  ;;  %v420_v46 = vmul.f32 0.75, %v286_v47 }
  0x43   : > { %3563 = vst [vmem:[#allocation30_spill] sm:$0xff] %v2385_v32  ;;  %v681_v60 = vmul.f32 0.25, %v287_v19  ;;  %v285_v53 = vadd.f32 %v2379_v2, %v2377_v50  ;;  %v2393_v48 = vmul.f32 0.75, %v141_v17  ;;  %v2395_v8 = vmul.f32 0.75, %v142_v45  ;;  %v143_v40 = vld [vmem:[%s2134_s11 + $0xd0] sm:$0x3] }
  0x44   : > { %3564 = vst [vmem:[#allocation31_spill] sm:$0xff] %v2388_v16  ;;  %v421_v28 = vmul.f32 0.75, %v287_v19  ;;  %v529_v5 = vrot.slane %v420_v46, 1  ;;  %v770_v57 = vrot.slane %v382_v7, 1  ;;  %v2397_v59 = vmul.f32 0.25, %v140_v43 }
  0x45   : > { %3565 = vst [vmem:[#allocation32_spill] sm:$0xff] %v2393_v48  ;;  %3566 = vst [vmem:[#allocation33_spill] sm:$0xff] %v2395_v8  ;;  %v772_v41 = vrot.slane %v681_v60, 1  ;;  %997 = vrot.lane.b32.xlu1 %v884_v11, %s2109_s12  ;;  %v381_v56 = vmul.f32 0.25, %v285_v53  ;;  %v419_v61 = vmul.f32 0.75, %v285_v53  ;;  %v288_v25 = vadd.f32 %v2393_v48, %v2388_v16 }
  0x46   : > { %3567 = vst [vmem:[#allocation34_spill] sm:$0xff] %v2397_v59  ;;  %v289_v47 = vadd.f32 %v2395_v8, %v2363_v18  ;;  %995 = vrot.lane.b32.xlu0 %v883_v51, %s2109_s12  ;;  %v531_v32 = vrot.slane %v421_v28, 1  ;;  %v2407_v43 = vmul.f32 0.25, %v143_v40  ;;  %v2414_v18 = vmul.f32 0.75, %v143_v40 }
  0x47   : > { %v773_v19 = vsel %vm497_vm0, %v770_v57, %v772_v41  ;;  %v887_v60 = vadd.f32 %v772_v41, %v421_v28  ;;  %v528_v2 = vrot.slane %v419_v61, 1  ;;  %v769_v53 = vrot.slane %v381_v56, 1 }
  0x48   : > { %3568 = vst [vmem:[#allocation35_spill] sm:$0xff] %v2407_v43  ;;  %v886_v11 = vadd.f32 %v773_v19, %v420_v46  ;;  %v2409_v50 = vmul.f32 0.25, %v288_v25  ;;  %v2411_v48 = vmul.f32 0.25, %v289_v47  ;;  %v422_v16 = vmul.f32 0.75, %v288_v25  ;;  %3571 = vst [vmem:[#allocation38_spill] sm:$0xff] %v2414_v18  ;;  %v145_v19 = vld [vmem:[%s2134_s11 + $0xe0] sm:$0xff] }
  0x49   : > { %v532_v8 = vsel %vm497_vm0, %v529_v5, %v531_v32  ;;  %v530_v51 = vsel %vm497_vm0, %v528_v2, %v529_v5  ;;  %v771_v28 = vsel %vm497_vm0, %v769_v53, %v770_v57  ;;  %v423_v1 = vmul.f32 0.75, %v289_v47  ;;  %v2443_v53 = vld [vmem:[%s2134_s11 + $0xf0] sm:$0xff] }
  0x4a   : > { %3569 = vst [vmem:[#allocation36_spill] sm:$0xff] %v2409_v50  ;;  %3570 = vst [vmem:[#allocation37_spill] sm:$0xff] %v2411_v48  ;;  %1001 = vrot.lane.b32.xlu1 %v886_v11, %s2109_s12  ;;  %v774_v46 = vrot.slane %v2409_v50, 1  ;;  %v2420_v41 = vadd.f32 %v532_v8, %v382_v7  ;;  %v2424_v44 = vadd.f32 %v530_v51, %v381_v56  ;;  %v533_v32 = vrot.slane %v422_v16, 1  ;;  %v144_v7 = vld [vmem:[%s2134_s11 + $0xd8] sm:$0xff] }
  0x4b   : > { %v885_v25 = vadd.f32 %v771_v28, %v419_v61  ;;  %v775_v40 = vrot.slane %v2411_v48, 1  ;;  %v290_v11 = vadd.f32 %v2414_v18, %v2397_v59  ;;  %v2429_v2 = vmul.f32 0.25, %v142_v45 }
  0x4c   : > { %v2431_v5 = vmul.f32 0.25, %v145_v19  ;;  %v2436_v57 = vmul.f32 0.75, %v145_v19  ;;  %v2438_v56 = vmul.f32 0.75, %v146_v9  ;;  %v2440_v61 = vmul.f32 0.25, %v141_v17  ;;  %655 = vst.msk [vmem:[%s2795_s16 + $0xc0] sm:$0xff] %vm642_vm1, %v2424_v44  ;;  %656 = vst.msk [vmem:[%s2795_s16 + $0xc8] sm:$0xff] %vm642_vm1, %v2420_v41 }
  0x4d   : > { %3572 = vst [vmem:[#allocation39_spill] sm:$0xff] %v2429_v2  ;;  %999 = vrot.lane.b32.xlu0 %v885_v25, %s2109_s12  ;;  %v776_v8 = vsel %vm497_vm0, %v774_v46, %v775_v40  ;;  %v424_v47 = vmul.f32 0.75, %v290_v11  ;;  %v682_v45 = vmul.f32 0.25, %v290_v11  ;;  %v534_v28 = vrot.slane %v423_v1, 1  ;;  %v148_v46 = vld [vmem:[%s2134_s11 + $0xf8] sm:$0xff] }
  0x4e   : > { %3573 = vst [vmem:[#allocation40_spill] sm:$0xff] %v2431_v5  ;;  %3574 = vst [vmem:[#allocation41_spill] sm:$0xff] %v2436_v57  ;;  %v888_v51 = vadd.f32 %v776_v8, %v422_v16  ;;  %v292_v48 = vadd.f32 %v2436_v57, %v2429_v2  ;;  %v293_v25 = vadd.f32 %v2438_v56, %v2407_v43  ;;  %v2449_v50 = vmul.f32 0.75, %v144_v7 }
  0x4f   : > { %3575 = vst [vmem:[#allocation42_spill] sm:$0xff] %v2438_v56  ;;  %3576 = vst [vmem:[#allocation43_spill] sm:$0xff] %v2440_v61  ;;  %v2452_v19 = vmul.f32 0.25, %v144_v7  ;;  %v536_v17 = vrot.slane %v424_v47, 1  ;;  %v777_v18 = vrot.slane %v682_v45, 1  ;;  %v2456_v16 = vsel %vm497_vm0, %v533_v32, %v534_v28 }
  0x50   : > { %3577 = vst [vmem:[#allocation44_spill] sm:$0xff] %v2449_v50  ;;  %1005 = vrot.lane.b32.xlu1 %v888_v51, %s2109_s12  ;;  %3579 = vst [vmem:[#allocation46_spill] sm:$0xff] %v2456_v16  ;;  %v2459_v11 = vmul.f32 0.75, %v2443_v53  ;;  %v386_v8 = vmul.f32 0.25, %v292_v48  ;;  %v426_v57 = vmul.f32 0.75, %v292_v48  ;;  %v683_v56 = vmul.f32 0.25, %v293_v25 }
  0x51   : > { %3578 = vst [vmem:[#allocation45_spill] sm:$0xff] %v2452_v19  ;;  %1003 = vrot.lane.b32.xlu0 %v887_v60, %s2109_s12  ;;  %v291_v7 = vadd.f32 %v2449_v50, %v2440_v61  ;;  %v890_v43 = vadd.f32 %v777_v18, %v424_v47  ;;  %v2465_v51 = vsel %vm497_vm0, %v534_v28, %v536_v17  ;;  %v2468_v32 = vmul.f32 0.75, %v148_v46  ;;  %v149_v28 = vld [vmem:[%s2134_s11 + $0x100] sm:$0x3] }
  0x52   : > { %3580 = vst [vmem:[#allocation47_spill] sm:$0xff] %v2459_v11  ;;  %3581 = vst [vmem:[#allocation48_spill] sm:$0xff] %v2465_v51  ;;  %v778_v45 = vsel %vm497_vm0, %v775_v40, %v777_v18  ;;  %v539_v2 = vrot.slane %v426_v57, 1  ;;  %v780_v59 = vrot.slane %v386_v8, 1  ;;  %v782_v36 = vrot.slane %v683_v56, 1 }
  0x53   : > { %3582 = vst [vmem:[#allocation49_spill] sm:$0xff] %v2468_v32  ;;  %v889_v16 = vadd.f32 %v778_v45, %v423_v1  ;;  %v385_v48 = vmul.f32 0.25, %v291_v7  ;;  %v425_v60 = vmul.f32 0.75, %v291_v7  ;;  %v294_v14 = vadd.f32 %v2459_v11, %v2452_v19 }
  0x54   : > { %1009 = vrot.lane.b32.xlu1 %v890_v43, %s2109_s12  ;;  %v295_v47 = vadd.f32 %v2468_v32, %v2431_v5  ;;  %v783_v18 = vsel %vm497_vm0, %v780_v59, %v782_v36  ;;  %v427_v40 = vmul.f32 0.75, %v293_v25  ;;  %v2478_v1 = vmul.f32 0.25, %v146_v9 }
  0x55   : > { %1007 = vrot.lane.b32.xlu0 %v889_v16, %s2109_s12  ;;  %v2480_v56 = vmul.f32 0.25, %v149_v28  ;;  %v892_v43 = vadd.f32 %v783_v18, %v426_v57  ;;  %v538_v17 = vrot.slane %v425_v60, 1  ;;  %v779_v7 = vrot.slane %v385_v48, 1  ;;  %v151_v18 = vld [vmem:[%s2134_s11 + $0x110] sm:$0xff] }
  0x56   : > { %3583 = vst [vmem:[#allocation50_spill] sm:$0xff] %v2478_v1  ;;  %v2482_v45 = vmul.f32 0.25, %v294_v14  ;;  %v2484_v51 = vmul.f32 0.25, %v295_v47  ;;  %v428_v11 = vmul.f32 0.75, %v294_v14  ;;  %v541_v32 = vrot.slane %v427_v40, 1 }
  0x57   : > { %3584 = vst [vmem:[#allocation51_spill] sm:$0xff] %v2480_v56  ;;  %v893_v50 = vadd.f32 %v782_v36, %v427_v40  ;;  %v540_v25 = vsel %vm497_vm0, %v538_v17, %v539_v2  ;;  %v781_v9 = vsel %vm497_vm0, %v779_v7, %v780_v59  ;;  %v2490_v57 = vmul.f32 0.75, %v149_v28  ;;  %v152_v17 = vld [vmem:[%s2134_s11 + $0x118] sm:$0x3]  ;;  %v150_v7 = vld [vmem:[%s2134_s11 + $0x108] sm:$0xff] }
  0x58   : > { %3585 = vst [vmem:[#allocation52_spill] sm:$0xff] %v2482_v45  ;;  %3586 = vst [vmem:[#allocation53_spill] sm:$0xff] %v2484_v51  ;;  %1013 = vrot.lane.b32.xlu1 %v892_v43, %s2109_s12  ;;  %v784_v16 = vrot.slane %v2482_v45, 1  ;;  %v2493_v5 = vadd.f32 %v540_v25, %v385_v48  ;;  %v891_v19 = vadd.f32 %v781_v9, %v425_v60  ;;  %v543_v61 = vrot.slane %v428_v11, 1 }
  0x59   : > { %3587 = vst [vmem:[#allocation54_spill] sm:$0xff] %v2490_v57  ;;  %v785_v14 = vrot.slane %v2484_v51, 1  ;;  %v542_v36 = vsel %vm497_vm0, %v539_v2, %v541_v32  ;;  %v296_v40 = vadd.f32 %v2490_v57, %v2478_v1  ;;  %v429_v43 = vmul.f32 0.75, %v295_v47  ;;  %v154_v57 = vld [vmem:[%s2134_s11 + $0x128] sm:$0xff] }
  0x5a   : > { %v2500_v59 = vmul.f32 0.25, %v148_v46  ;;  %1011 = vrot.lane.b32.xlu0 %v891_v19, %s2109_s12  ;;  %v2505_v28 = vadd.f32 %v542_v36, %v386_v8  ;;  %v2507_v60 = vmul.f32 0.25, %v151_v18  ;;  %v2509_v25 = vmul.f32 0.75, %v151_v18  ;;  %v2521_v8 = vld [vmem:[%s2134_s11 + $0x120] sm:$0xff]  ;;  %659 = vst.msk [vmem:[%s2795_s16 + $0x100] sm:$0xff] %vm642_vm1, %v2493_v5 }
  0x5b   : > { %v786_v48 = vsel %vm497_vm0, %v784_v16, %v785_v14  ;;  %v430_v32 = vmul.f32 0.75, %v296_v40  ;;  %v684_v9 = vmul.f32 0.25, %v296_v40  ;;  %v544_v51 = vrot.slane %v429_v43, 1 }
  0x5c   : > { %3588 = vst [vmem:[#allocation55_spill] sm:$0xff] %v2500_v59  ;;  %3589 = vst [vmem:[#allocation56_spill] sm:$0xff] %v2507_v60  ;;  %v894_v2 = vadd.f32 %v786_v48, %v428_v11  ;;  %v2511_v47 = vmul.f32 0.75, %v152_v17  ;;  %v298_v46 = vadd.f32 %v2509_v25, %v2500_v59  ;;  %v2516_v19 = vmul.f32 0.25, %v2443_v53 }
  0x5d   : > { %3590 = vst [vmem:[#allocation57_spill] sm:$0xff] %v2509_v25  ;;  %v2518_v16 = vmul.f32 0.75, %v150_v7  ;;  %v546_v18 = vrot.slane %v430_v32, 1  ;;  %v787_v11 = vrot.slane %v684_v9, 1  ;;  %v2525_v36 = vsel %vm497_vm0, %v543_v61, %v544_v51  ;;  %660 = vst.msk [vmem:[%s2795_s16 + $0x108] sm:$0xff] %vm642_vm1, %v2505_v28 }
  0x5e   : > { %3591 = vst [vmem:[#allocation58_spill] sm:$0xff] %v2511_v47  ;;  %3592 = vst [vmem:[#allocation59_spill] sm:$0xff] %v2516_v19  ;;  %1017 = vrot.lane.b32.xlu1 %v894_v2, %s2109_s12  ;;  %v2527_v40 = vmul.f32 0.25, %v150_v7  ;;  %1015 = vrot.lane.b32.xlu0 %v893_v50, %s2109_s12  ;;  %v299_v48 = vadd.f32 %v2511_v47, %v2480_v56  ;;  %v390_v53 = vmul.f32 0.25, %v298_v46  ;;  %v432_v45 = vmul.f32 0.75, %v298_v46 }
  0x5f   : > { %3593 = vst [vmem:[#allocation60_spill] sm:$0xff] %v2518_v16  ;;  %3594 = vst [vmem:[#allocation61_spill] sm:$0xff] %v2525_v36  ;;  %v297_v25 = vadd.f32 %v2518_v16, %v2516_v19  ;;  %v896_v2 = vadd.f32 %v787_v11, %v430_v32  ;;  %v2536_v9 = vsel %vm497_vm0, %v544_v51, %v546_v18  ;;  %v2540_v7 = vmul.f32 0.75, %v2521_v8  ;;  %v155_v51 = vld [vmem:[%s2134_s11 + $0x130] sm:$0x3] }
  0x60   : > { %3595 = vst [vmem:[#allocation62_spill] sm:$0xff] %v2527_v40  ;;  %3596 = vst [vmem:[#allocation63_spill] sm:$0xff] %v2536_v9  ;;  %v788_v61 = vsel %vm497_vm0, %v785_v14, %v787_v11  ;;  %v549_v36 = vrot.slane %v432_v45, 1  ;;  %v685_v59 = vmul.f32 0.25, %v299_v48  ;;  %v790_v47 = vrot.slane %v390_v53, 1 }
  0x61   : > { %3597 = vst [vmem:[#allocation64_spill] sm:$0xff] %v2540_v7  ;;  %v895_v50 = vadd.f32 %v788_v61, %v429_v43  ;;  %v389_v46 = vmul.f32 0.25, %v297_v25  ;;  %v431_v56 = vmul.f32 0.75, %v297_v25  ;;  %v2543_v1 = vmul.f32 0.75, %v154_v57 }
  0x62   : > { %1021 = vrot.lane.b32.xlu1 %v896_v2, %s2109_s12  ;;  %v300_v32 = vadd.f32 %v2540_v7, %v2527_v40  ;;  %v792_v14 = vrot.slane %v685_v59, 1  ;;  %v433_v18 = vmul.f32 0.75, %v299_v48  ;;  %v2549_v11 = vmul.f32 0.25, %v152_v17 }
  0x63   : > { %3598 = vst [vmem:[#allocation65_spill] sm:$0xff] %v2543_v1  ;;  %1019 = vrot.lane.b32.xlu0 %v895_v50, %s2109_s12  ;;  %v2551_v43 = vmul.f32 0.25, %v155_v51  ;;  %v548_v61 = vrot.slane %v431_v56, 1  ;;  %v789_v9 = vrot.slane %v389_v46, 1  ;;  %v301_v25 = vadd.f32 %v2543_v1, %v2507_v60 }
  0x64   : > { %3599 = vst [vmem:[#allocation66_spill] sm:$0xff] %v2549_v11  ;;  %v2555_v2 = vmul.f32 0.25, %v300_v32  ;;  %v793_v7 = vsel %vm497_vm0, %v790_v47, %v792_v14  ;;  %v434_v16 = vmul.f32 0.75, %v300_v32  ;;  %v551_v40 = vrot.slane %v433_v18, 1 }
  0x65   : > { %3600 = vst [vmem:[#allocation67_spill] sm:$0xff] %v2551_v43  ;;  %v899_v50 = vadd.f32 %v792_v14, %v433_v18  ;;  %v898_v59 = vadd.f32 %v793_v7, %v432_v45  ;;  %v550_v17 = vsel %vm497_vm0, %v548_v61, %v549_v36  ;;  %v791_v48 = vsel %vm497_vm0, %v789_v9, %v790_v47  ;;  %v156_v9 = vld [vmem:[%s2134_s11 + $0x138] sm:$0xff] }
  0x66   : > { %3601 = vst [vmem:[#allocation68_spill] sm:$0xff] %v2555_v2  ;;  %v2560_v19 = vmul.f32 0.25, %v301_v25  ;;  %v2563_v39 = vadd.f32 %v550_v17, %v389_v46  ;;  %v897_v13 = vadd.f32 %v791_v48, %v431_v56  ;;  %v553_v1 = vrot.slane %v434_v16, 1 }
  0x67   : > { %v794_v60 = vrot.slane %v2555_v2, 1  ;;  %1025 = vrot.lane.b32.xlu1 %v898_v59, %s2109_s12  ;;  %v552_v45 = vsel %vm497_vm0, %v549_v36, %v551_v40  ;;  %v2570_v7 = vmul.f32 0.75, %v155_v51  ;;  %v435_v47 = vmul.f32 0.75, %v301_v25 }
  0x68   : > { %3602 = vst [vmem:[#allocation69_spill] sm:$0xff] %v2560_v19  ;;  %v795_v32 = vrot.slane %v2560_v19, 1  ;;  %1023 = vrot.lane.b32.xlu0 %v897_v13, %s2109_s12  ;;  %v2574_v46 = vadd.f32 %v552_v45, %v390_v53  ;;  %v2576_v56 = vmul.f32 0.25, %v154_v57  ;;  %v2578_v14 = vmul.f32 0.25, %v157_v37  ;;  %663 = vst.msk [vmem:[%s2795_s16 + $0x140] sm:$0xff] %vm642_vm1, %v2563_v39 }
  0x69   : > { %3603 = vst [vmem:[#allocation70_spill] sm:$0xff] %v2570_v7  ;;  %v2580_v18 = vmul.f32 0.75, %v157_v37  ;;  %v302_v36 = vadd.f32 %v2570_v7, %v2549_v11  ;;  %v554_v40 = vrot.slane %v435_v47, 1  ;;  %v2585_v51 = vmul.f32 0.75, %v158_v54  ;;  %v2595_v37 = vld [vmem:[%s2134_s11 + $0x150] sm:$0xff] }
  0x6a   : > { %3604 = vst [vmem:[#allocation71_spill] sm:$0xff] %v2576_v56  ;;  %3605 = vst [vmem:[#allocation72_spill] sm:$0xff] %v2578_v14  ;;  %v796_v61 = vsel %vm497_vm0, %v794_v60, %v795_v32  ;;  %v2590_v53 = vmul.f32 0.25, %v2521_v8  ;;  %v2592_v57 = vmul.f32 0.75, %v156_v9 }
  0x6b   : > { %3606 = vst [vmem:[#allocation73_spill] sm:$0xff] %v2580_v18  ;;  %3607 = vst [vmem:[#allocation74_spill] sm:$0xff] %v2585_v51  ;;  %v900_v25 = vadd.f32 %v796_v61, %v434_v16  ;;  %v304_v13 = vadd.f32 %v2580_v18, %v2576_v56  ;;  %v436_v59 = vmul.f32 0.75, %v302_v36  ;;  %v686_v60 = vmul.f32 0.25, %v302_v36  ;;  %v160_v18 = vld [vmem:[%s2134_s11 + $0x158] sm:$0xff] }
  0x6c   : > { %3608 = vst [vmem:[#allocation75_spill] sm:$0xff] %v2590_v53  ;;  %3609 = vst [vmem:[#allocation76_spill] sm:$0xff] %v2592_v57  ;;  %v2598_v17 = vsel %vm497_vm0, %v553_v1, %v554_v40  ;;  %v305_v48 = vadd.f32 %v2585_v51, %v2551_v43  ;;  %1027 = vrot.lane.b32.xlu0 %v899_v50, %s2109_s12  ;;  %v303_v45 = vadd.f32 %v2592_v57, %v2590_v53 }
  0x6d   : > { %3610 = vst [vmem:[#allocation77_spill] sm:$0xff] %v2598_v17  ;;  %1029 = vrot.lane.b32.xlu1 %v900_v25, %s2109_s12  ;;  %v394_v16 = vmul.f32 0.25, %v304_v13  ;;  %v438_v8 = vmul.f32 0.75, %v304_v13  ;;  %v2606_v61 = vmul.f32 0.25, %v156_v9  ;;  %v556_v19 = vrot.slane %v436_v59, 1  ;;  %664 = vst.msk [vmem:[%s2795_s16 + $0x148] sm:$0xff] %vm642_vm1, %v2574_v46 }
  0x6e   : > { %v797_v2 = vrot.slane %v686_v60, 1  ;;  %v687_v36 = vmul.f32 0.25, %v305_v48  ;;  %v2610_v1 = vmul.f32 0.75, %v2595_v37  ;;  %v393_v7 = vmul.f32 0.25, %v303_v45 }
  0x6f   : > { %3611 = vst [vmem:[#allocation78_spill] sm:$0xff] %v2606_v61  ;;  %v559_v17 = vrot.slane %v438_v8, 1  ;;  %v800_v51 = vrot.slane %v394_v16, 1  ;;  %v437_v25 = vmul.f32 0.75, %v303_v45  ;;  %v2613_v50 = vsel %vm497_vm0, %v554_v40, %v556_v19  ;;  %v161_v40 = vld [vmem:[%s2134_s11 + $0x160] sm:$0x3] }
  0x70   : > { %3612 = vst [vmem:[#allocation79_spill] sm:$0xff] %v2610_v1  ;;  %v902_v43 = vadd.f32 %v797_v2, %v436_v59  ;;  %3613 = vst [vmem:[#allocation80_spill] sm:$0xff] %v2613_v50  ;;  %v798_v13 = vsel %vm497_vm0, %v795_v32, %v797_v2  ;;  %v802_v9 = vrot.slane %v687_v36, 1  ;;  %v799_v60 = vrot.slane %v393_v7, 1 }
  0x71   : > { %v901_v57 = vadd.f32 %v798_v13, %v435_v47  ;;  %v558_v53 = vrot.slane %v437_v25, 1  ;;  %v2616_v56 = vmul.f32 0.75, %v160_v18  ;;  %v306_v45 = vadd.f32 %v2610_v1, %v2606_v61 }
  0x72   : > { %1033 = vrot.lane.b32.xlu1 %v902_v43, %s2109_s12  ;;  %v803_v11 = vsel %vm497_vm0, %v800_v51, %v802_v9  ;;  %v439_v59 = vmul.f32 0.75, %v305_v48  ;;  %v2622_v19 = vmul.f32 0.25, %v158_v54  ;;  %v801_v47 = vsel %vm497_vm0, %v799_v60, %v800_v51 }
  0x73   : > { %3614 = vst [vmem:[#allocation81_spill] sm:$0xff] %v2616_v56  ;;  %1031 = vrot.lane.b32.xlu0 %v901_v57, %s2109_s12  ;;  %v904_v2 = vadd.f32 %v803_v11, %v438_v8  ;;  %v560_v32 = vsel %vm497_vm0, %v558_v53, %v559_v17  ;;  %v307_v43 = vadd.f32 %v2616_v56, %v2578_v14  ;;  %v2632_v48 = vmul.f32 0.25, %v306_v45  ;;  %v163_v53 = vld [vmem:[%s2134_s11 + $0x170] sm:$0xff]  ;;  %v162_v8 = vld [vmem:[%s2134_s11 + $0x168] sm:$0xff] }
  0x74   : > { %3615 = vst [vmem:[#allocation82_spill] sm:$0xff] %v2622_v19  ;;  %v2630_v36 = vadd.f32 %v560_v32, %v393_v7  ;;  %v903_v13 = vadd.f32 %v801_v47, %v437_v25  ;;  %v440_v54 = vmul.f32 0.75, %v306_v45  ;;  %v561_v1 = vrot.slane %v439_v59, 1  ;;  %v164_v25 = vld [vmem:[%s2134_s11 + $0x178] sm:$0x3] }
  0x75   : > { %3616 = vst [vmem:[#allocation83_spill] sm:$0xff] %v2632_v48  ;;  %v2634_v50 = vmul.f32 0.25, %v307_v43  ;;  %v905_v57 = vadd.f32 %v802_v9, %v439_v59  ;;  %v2636_v11 = vmul.f32 0.25, %v161_v40  ;;  %v804_v60 = vrot.slane %v2632_v48, 1 }
  0x76   : > { %1037 = vrot.lane.b32.xlu1 %v904_v2, %s2109_s12  ;;  %v563_v51 = vrot.slane %v440_v54, 1  ;;  %v2642_v56 = vmul.f32 0.75, %v161_v40  ;;  %v441_v7 = vmul.f32 0.75, %v307_v43  ;;  %v562_v9 = vsel %vm497_vm0, %v559_v17, %v561_v1  ;;  %v166_v1 = vld [vmem:[%s2134_s11 + $0x188] sm:$0xff]  ;;  %667 = vst.msk [vmem:[%s2795_s16 + $0x180] sm:$0xff] %vm642_vm1, %v2630_v36 }
  0x77   : > { %3617 = vst [vmem:[#allocation84_spill] sm:$0xff] %v2634_v50  ;;  %3618 = vst [vmem:[#allocation85_spill] sm:$0xff] %v2636_v11  ;;  %1035 = vrot.lane.b32.xlu0 %v903_v13, %s2109_s12  ;;  %v805_v45 = vrot.slane %v2634_v50, 1  ;;  %v2648_v59 = vmul.f32 0.25, %v160_v18  ;;  %v2650_v32 = vmul.f32 0.25, %v163_v53  ;;  %v2652_v2 = vadd.f32 %v562_v9, %v394_v16  ;;  %v165_v18 = vld [vmem:[%s2134_s11 + $0x180] sm:$0xff] }
  0x78   : > { %3619 = vst [vmem:[#allocation86_spill] sm:$0xff] %v2642_v56  ;;  %v308_v47 = vadd.f32 %v2642_v56, %v2622_v19  ;;  %v564_v40 = vrot.slane %v441_v7, 1  ;;  %v2656_v48 = vmul.f32 0.75, %v163_v53  ;;  %v2659_v14 = vmul.f32 0.75, %v164_v25 }
  0x79   : > { %3620 = vst [vmem:[#allocation87_spill] sm:$0xff] %v2648_v59  ;;  %v806_v43 = vsel %vm497_vm0, %v804_v60, %v805_v45  ;;  %v2662_v13 = vmul.f32 0.25, %v2595_v37  ;;  %v2664_v17 = vmul.f32 0.75, %v162_v8  ;;  %v2678_v56 = vmul.f32 0.25, %v162_v8  ;;  %668 = vst.msk [vmem:[%s2795_s16 + $0x188] sm:$0xff] %vm642_vm1, %v2652_v2 }
  0x7a   : > { %3621 = vst [vmem:[#allocation88_spill] sm:$0xff] %v2656_v48  ;;  %3622 = vst [vmem:[#allocation89_spill] sm:$0xff] %v2659_v14  ;;  %v906_v50 = vadd.f32 %v806_v43, %v440_v54  ;;  %v442_v16 = vmul.f32 0.75, %v308_v47  ;;  %v688_v9 = vmul.f32 0.25, %v308_v47  ;;  %v2669_v61 = vsel %vm497_vm0, %v563_v51, %v564_v40 }
  0x7b   : > { %3623 = vst [vmem:[#allocation90_spill] sm:$0xff] %v2662_v13  ;;  %3624 = vst [vmem:[#allocation91_spill] sm:$0xff] %v2664_v17  ;;  %1039 = vrot.lane.b32.xlu0 %v905_v57, %s2109_s12  ;;  %v310_v53 = vadd.f32 %v2656_v48, %v2648_v59  ;;  %v311_v60 = vadd.f32 %v2659_v14, %v2636_v11  ;;  %v309_v37 = vadd.f32 %v2664_v17, %v2662_v13  ;;  %v167_v13 = vld [vmem:[%s2134_s11 + $0x190] sm:$0x3] }
  0x7c   : > { %3625 = vst [vmem:[#allocation92_spill] sm:$0xff] %v2669_v61  ;;  %1041 = vrot.lane.b32.xlu1 %v906_v50, %s2109_s12  ;;  %v566_v54 = vrot.slane %v442_v16, 1  ;;  %v807_v47 = vrot.slane %v688_v9, 1  ;;  %v2681_v51 = vmul.f32 0.75, %v165_v18  ;;  %v2683_v43 = vmul.f32 0.75, %v166_v1 }
  0x7d   : > { %v398_v57 = vmul.f32 0.25, %v310_v53  ;;  %v444_v61 = vmul.f32 0.75, %v310_v53  ;;  %v689_v48 = vmul.f32 0.25, %v311_v60  ;;  %v397_v59 = vmul.f32 0.25, %v309_v37 }
  0x7e   : > { %3626 = vst [vmem:[#allocation93_spill] sm:$0xff] %v2681_v51  ;;  %3627 = vst [vmem:[#allocation94_spill] sm:$0xff] %v2683_v43  ;;  %v908_v19 = vadd.f32 %v807_v47, %v442_v16  ;;  %v2686_v14 = vsel %vm497_vm0, %v564_v40, %v566_v54  ;;  %v808_v17 = vsel %vm497_vm0, %v805_v45, %v807_v47  ;;  %v443_v8 = vmul.f32 0.75, %v309_v37 }
  0x7f   : > { %3628 = vst [vmem:[#allocation95_spill] sm:$0xff] %v2686_v14  ;;  %v907_v11 = vadd.f32 %v808_v17, %v441_v7  ;;  %v569_v50 = vrot.slane %v444_v61, 1  ;;  %v810_v35 = vrot.slane %v398_v57, 1  ;;  %v812_v9 = vrot.slane %v689_v48, 1 }
  0x80   : > { %1045 = vrot.lane.b32.xlu1 %v908_v19, %s2109_s12  ;;  %v568_v18 = vrot.slane %v443_v8, 1  ;;  %v809_v1 = vrot.slane %v397_v59, 1  ;;  %v312_v53 = vadd.f32 %v2681_v51, %v2678_v56  ;;  %v313_v16 = vadd.f32 %v2683_v43, %v2650_v32 }
  0x81   : > { %1043 = vrot.lane.b32.xlu0 %v907_v11, %s2109_s12  ;;  %v813_v45 = vsel %vm497_vm0, %v810_v35, %v812_v9  ;;  %v445_v40 = vmul.f32 0.75, %v311_v60  ;;  %v2697_v37 = vmul.f32 0.25, %v164_v25  ;;  %v2699_v7 = vmul.f32 0.75, %v167_v13 }
  0x82   : > { %v910_v48 = vadd.f32 %v813_v45, %v444_v61  ;;  %v570_v19 = vsel %vm497_vm0, %v568_v18, %v569_v50  ;;  %v811_v17 = vsel %vm497_vm0, %v809_v1, %v810_v35  ;;  %v2703_v54 = vmul.f32 0.25, %v312_v53 }
  0x83   : > { %v2705_v47 = vadd.f32 %v570_v19, %v397_v59  ;;  %v909_v14 = vadd.f32 %v811_v17, %v443_v8  ;;  %v2707_v43 = vmul.f32 0.25, %v313_v16  ;;  %v446_v11 = vmul.f32 0.75, %v312_v53 }
  0x84   : > { %3629 = vst [vmem:[#allocation96_spill] sm:$0xff] %v2703_v54  ;;  %1049 = vrot.lane.b32.xlu1 %v910_v48, %s2109_s12  ;;  %v814_v25 = vrot.slane %v2703_v54, 1  ;;  %v571_v60 = vrot.slane %v445_v40, 1  ;;  %v911_v51 = vadd.f32 %v812_v9, %v445_v40  ;;  %v314_v61 = vadd.f32 %v2699_v7, %v2697_v37 }
  0x85   : > { %3630 = vst [vmem:[#allocation97_spill] sm:$0xff] %v2707_v43  ;;  %1047 = vrot.lane.b32.xlu0 %v909_v14, %s2109_s12  ;;  %v573_v35 = vrot.slane %v446_v11, 1  ;;  %v815_v18 = vrot.slane %v2707_v43, 1  ;;  %v2715_v59 = vmul.f32 0.25, %v167_v13  ;;  %v447_v8 = vmul.f32 0.75, %v313_v16  ;;  %671 = vst.msk [vmem:[%s2795_s16 + $0x1c0] sm:$0xff] %vm642_vm1, %v2705_v47 }
  0x86   : > { %v572_v1 = vsel %vm497_vm0, %v569_v50, %v571_v60  ;;  %v448_v53 = vmul.f32 0.75, %v314_v61  ;;  %v690_v45 = vmul.f32 0.25, %v314_v61  ;;  %v322_v48 = vadd.f32 %v2159_v22, %v2201_v62 }
  0x87   : > { %v816_v9 = vsel %vm497_vm0, %v814_v25, %v815_v18  ;;  %v2721_v40 = vadd.f32 %v572_v1, %v398_v57  ;;  %v574_v19 = vrot.slane %v447_v8, 1  ;;  %v1463_v14 = vmul.f32 0.25, %v2161_v24 }
  0x88   : > { %v912_v17 = vadd.f32 %v816_v9, %v446_v11  ;;  %v576_v54 = vrot.slane %v448_v53, 1  ;;  %v817_v43 = vrot.slane %v690_v45, 1  ;;  %v1159_v13 = vmul.f32 0.25, %v322_v48 }
  0x89   : > { %1051 = vrot.lane.b32.xlu0 %v911_v51, %s2109_s12  ;;  %v2726_v50 = vsel %vm497_vm0, %v573_v35, %v574_v19  ;;  %v1191_v16 = vmul.f32 0.75, %v322_v48  ;;  %v1530_v60 = vrot.slane %v1463_v14, 1  ;;  %v321_v22 = vadd.f32 %v2157_v21, %v2235_v30  ;;  %672 = vst.msk [vmem:[%s2795_s16 + $0x1c8] sm:$0xff] %vm642_vm1, %v2721_v40 }
  0x8a   : > { %1053 = vrot.lane.b32.xlu1 %v912_v17, %s2109_s12  ;;  %v914_v62 = vadd.f32 %v817_v43, %v448_v53  ;;  %v2732_v57 = vsel %vm497_vm0, %v574_v19, %v576_v54  ;;  %v818_v11 = vsel %vm497_vm0, %v815_v18, %v817_v43  ;;  %v1528_v25 = vrot.slane %v1159_v13, 1 }
  0x8b   : > { %v913_v61 = vadd.f32 %v818_v11, %v447_v8  ;;  %v1287_v1 = vrot.slane %v1191_v16, 1  ;;  %v1158_v51 = vmul.f32 0.25, %v321_v22  ;;  %v1190_v45 = vmul.f32 0.75, %v321_v22 }
  0x8c   : > { %v1531_v35 = vsel %vm497_vm0, %v1528_v25, %v1530_v60  ;;  %v324_v48 = vadd.f32 %v2190_v52, %v2214_v12  ;;  %v325_v21 = vadd.f32 %v2194_v55, %v2204_v3  ;;  %v1192_v30 = vmul.f32 0.75, %v2161_v24 }
  0x8d   : > { %1055 = vrot.lane.b32.xlu0 %v913_v61, %s2109_s12  ;;  %v1656_v54 = vadd.f32 %v1531_v35, %v1191_v16  ;;  %v1286_v53 = vrot.slane %v1190_v45, 1  ;;  %v1527_v43 = vrot.slane %v1158_v51, 1  ;;  %v326_v18 = vadd.f32 %v2146_v6, %v2141_v4 }
  0x8e   : > { %1057 = vrot.lane.b32.xlu1 %v914_v62, %s2109_s12  ;;  %v2745_v8 = vmul.f32 0.25, %v324_v48  ;;  %v2747_v9 = vmul.f32 0.25, %v325_v21  ;;  %v1193_v52 = vmul.f32 0.75, %v324_v48  ;;  %v1289_v12 = vrot.slane %v1192_v30, 1 }
  0x8f   : > { %v1288_v55 = vsel %vm497_vm0, %v1286_v53, %v1287_v1  ;;  %v1529_v24 = vsel %vm497_vm0, %v1527_v43, %v1528_v25  ;;  %v1657_v3 = vadd.f32 %v1530_v60, %v1192_v30  ;;  %v1195_v19 = vmul.f32 0.75, %v326_v18 }
  0x90   : > { %v2751_v14 = vadd.f32 %v1288_v55, %v1158_v51  ;;  %v1655_v17 = vadd.f32 %v1529_v24, %v1190_v45  ;;  %v1291_v16 = vrot.slane %v1193_v52, 1  ;;  %v1532_v4 = vrot.slane %v2745_v8, 1 }
  0x91   : > { %v1533_v6 = vrot.slane %v2747_v9, 1  ;;  %v1290_v22 = vsel %vm497_vm0, %v1287_v1, %v1289_v12  ;;  %v1294_v62 = vrot.slane %v1195_v19, 1  ;;  %v1464_v11 = vmul.f32 0.25, %v326_v18  ;;  %v2763_v45 = vpop.permute.xlu0 %979 }
  0x92   : > { %1753 = vrot.lane.b32.xlu1 %v1656_v54, %s2109_s12  ;;  %1751 = vrot.lane.b32.xlu0 %v1655_v17, %s2109_s12  ;;  %v1399_v25 = vadd.f32 %v1290_v22, %v1159_v13  ;;  %v1194_v60 = vmul.f32 0.75, %v325_v21  ;;  %v328_v61 = vadd.f32 %v2211_v10, %v2273_v58  ;;  %v2761_v51 = vmul.f32 0.25, %v2155_v20  ;;  %v2770_v54 = vpop.permute.xlu1 %967  ;;  %2006 = vst.msk [vmem:[%s2795_s16 + $0x10] sm:$0xff] %vm642_vm1, %v2751_v14  ;;  %v3631_v14 = vld [vmem:[#allocation18_spill] sm:$0xff] }
  0x93   : > { %v1534_v35 = vsel %vm497_vm0, %v1532_v4, %v1533_v6  ;;  %v1535_v1 = vrot.slane %v1464_v11, 1  ;;  %v327_v48 = vadd.f32 %v2241_v34, %v2313_v27  ;;  %v330_v30 = vadd.f32 %v2230_v23, %v2319_v26  ;;  %v3632_v11 = vld [vmem:[#allocation9_spill] sm:$0xff] }
  0x94   : > { %v1658_v13 = vadd.f32 %v1534_v35, %v1193_v52  ;;  %v1292_v21 = vrot.slane %v1194_v60, 1  ;;  %v2772_v53 = vmul.f32 0.25, %v328_v61  ;;  %v1197_v10 = vmul.f32 0.75, %v328_v61  ;;  %2007 = vst.msk [vmem:[%s2795_s16 + $0x18] sm:$0xff] %vm642_vm1, %v1399_v25 }
  0x95   : > { %v1660_v58 = vadd.f32 %v1535_v1, %v1195_v19  ;;  %v1536_v43 = vsel %vm497_vm0, %v1533_v6, %v1535_v1  ;;  %v1540_v18 = vrot.slane %v2761_v51, 1  ;;  %v1162_v12 = vmul.f32 0.25, %v327_v48  ;;  %v2785_v52 = vpop.permute.xlu0 %963 }
  0x96   : > { %1757 = vrot.lane.b32.xlu1 %v1658_v13, %s2109_s12  ;;  %1755 = vrot.lane.b32.xlu0 %v1657_v3, %s2109_s12  ;;  %v2780_v23 = vsel %vm497_vm0, %v1291_v16, %v1292_v21  ;;  %v2783_v34 = vsel %vm497_vm0, %v1292_v21, %v1294_v62  ;;  %v1659_v27 = vadd.f32 %v1536_v43, %v1194_v60  ;;  %v1297_v26 = vrot.slane %v1197_v10, 1  ;;  %v2790_v4 = vpop.permute.xlu1 %973  ;;  %v3636_v13 = vld [vmem:[#allocation5_spill] sm:$0xff]  ;;  %v3640_v43 = vld [vmem:[#allocation12_spill] sm:$0xff] }
  0x97   : > { %v1538_v55 = vrot.slane %v2772_v53, 1  ;;  %v1196_v24 = vmul.f32 0.75, %v327_v48  ;;  %v1537_v19 = vrot.slane %v1162_v12, 1  ;;  %v331_v17 = vadd.f32 %v2233_v29, %v2282_v0 }
  0x98   : > { %v2797_v3 = vmul.f32 0.25, %v330_v30  ;;  %v2799_v16 = vmul.f32 0.75, %v330_v30  ;;  %v1198_v29 = vmul.f32 0.75, %v2155_v20  ;;  %v615_v36 = vadd.f32 %v2263_v42, %v2237_v31  ;;  %v3634_v42 = vld [vmem:[#allocation7_spill] sm:$0xff]  ;;  %v3635_v30 = vld [vmem:[#allocation2_spill] sm:$0xff] }
  0x99   : > { %v1541_v0 = vsel %vm497_vm0, %v1538_v55, %v1540_v18  ;;  %v1296_v6 = vrot.slane %v1196_v24, 1  ;;  %v1539_v22 = vsel %vm497_vm0, %v1537_v19, %v1538_v55  ;;  %v2804_v62 = vmul.f32 0.25, %v331_v17  ;;  %v966_v44 = vpop.permute.xlu0 %965  ;;  %v3644_v55 = vld [vmem:[#allocation6_spill] sm:$0xff] }
  0x9a   : > { %1761 = vrot.lane.b32.xlu1 %v1660_v58, %s2109_s12  ;;  %1759 = vrot.lane.b32.xlu0 %v1659_v27, %s2109_s12  ;;  %v1662_v20 = vadd.f32 %v1541_v0, %v1197_v10  ;;  %v1661_v39 = vadd.f32 %v1539_v22, %v1196_v24  ;;  %v1301_v49 = vrot.slane %v2799_v16, 1  ;;  %v1542_v33 = vrot.slane %v2797_v3, 1  ;;  %648 = vst.msk [vmem:[%s2795_s16 + $0x48] sm:$0xff] %vm642_vm1, %v615_v36  ;;  %v3638_v10 = vld [vmem:[#allocation11_spill] sm:$0xff] }
  0x9b   : > { %v1298_v63 = vsel %vm497_vm0, %v1296_v6, %v1297_v26  ;;  %v1543_v41 = vrot.slane %v2804_v62, 1  ;;  %v1299_v5 = vrot.slane %v1198_v29, 1  ;;  %v1663_v28 = vadd.f32 %v1540_v18, %v1198_v29  ;;  %1118 = vst.msk [vmem:[%s2795_s16 + $0x4f] sm:$0x1] %vm1111_vm2, %v2763_v45  ;;  %v3639_v45 = vld [vmem:[#allocation19_spill] sm:$0xff] }
  0x9c   : > { %v1402_v46 = vadd.f32 %v1298_v63, %v1162_v12  ;;  %v611_v2 = vadd.f32 %v2223_v15, %v2178_v38  ;;  %v332_v25 = vadd.f32 %v3632_v11, %v3631_v14  ;;  %v1200_v60 = vmul.f32 0.75, %v331_v17  ;;  %v970_v61 = vpop.permute.xlu1 %969  ;;  %v3633_v15 = vld [vmem:[#allocation4_spill] sm:$0xff]  ;;  %v3648_v11 = vld [vmem:[#allocation17_spill] sm:$0xff] }
  0x9d   : > { %v1544_v47 = vsel %vm497_vm0, %v1542_v33, %v1543_v41  ;;  %v1300_v40 = vsel %vm497_vm0, %v1297_v26, %v1299_v5  ;;  %v613_v51 = vadd.f32 %v3634_v42, %v3633_v15  ;;  %v610_v21 = vadd.f32 %v3636_v13, %v3635_v30  ;;  %v3641_v12 = vld [vmem:[#allocation28_spill] sm:$0xff]  ;;  %v3643_v26 = vld [vmem:[#allocation3_spill] sm:$0xff]  ;;  %v972_v19 = vpop.permute.xlu0 %971 }
  0x9e   : > { %1765 = vrot.lane.b32.xlu1 %v1662_v20, %s2109_s12  ;;  %1763 = vrot.lane.b32.xlu0 %v1661_v39, %s2109_s12  ;;  %v1664_v31 = vadd.f32 %v1544_v47, %v2799_v16  ;;  %v1403_v38 = vadd.f32 %v1300_v40, %v2772_v53  ;;  %2010 = vst.msk [vmem:[%s2795_s16 + $0x50] sm:$0xff] %vm642_vm1, %v1402_v46  ;;  %644 = vst.msk [vmem:[%s2795_s16 + $0x8] sm:$0xff] %vm642_vm1, %v611_v2  ;;  %v1201_v35 = vmul.f32 0.75, %v332_v25  ;;  %v3637_v53 = vld [vmem:[#allocation23_spill] sm:$0xff]  ;;  %v3646_v47 = vld [vmem:[#allocation16_spill] sm:$0xff] }
  0x9f   : > { %1112 = vst.msk [vmem:[%s2795_s16 + $0xf] sm:$0x1] %vm1111_vm2, %v2770_v54  ;;  %v1466_v1 = vmul.f32 0.25, %v332_v25  ;;  %v1302_v48 = vrot.slane %v1200_v60, 1  ;;  %v334_v58 = vadd.f32 %v3638_v10, %v3637_v53  ;;  %v335_v18 = vadd.f32 %v3640_v43, %v3639_v45  ;;  %v3642_v54 = vld [vmem:[#allocation15_spill] sm:$0xff]  ;;  %v3647_v14 = vld [vmem:[#allocation24_spill] sm:$0xff] }
  0xa0   : > { %2011 = vst.msk [vmem:[%s2795_s16 + $0x58] sm:$0xff] %vm642_vm1, %v1403_v38  ;;  %646 = vst.msk [vmem:[%s2795_s16 + $0x28] sm:$0xff] %vm642_vm1, %v613_v51  ;;  %v333_v27 = vadd.f32 %v3642_v54, %v3641_v12  ;;  %v612_v24 = vadd.f32 %v3644_v55, %v3643_v26  ;;  %v1304_v17 = vrot.slane %v1201_v35, 1  ;;  %v978_v0 = vpop.permute.xlu1 %977  ;;  %v3645_v2 = vld [vmem:[#allocation31_spill] sm:$0xff]  ;;  %v337_v25 = vadd.f32 %v3648_v11, %v3647_v14  ;;  %v3650_v38 = vld [vmem:[#allocation20_spill] sm:$0xff] }
  0xa1   : > { %v1545_v16 = vrot.slane %v1466_v1, 1  ;;  %v2897_v29 = vsel %vm497_vm0, %v1301_v49, %v1302_v48  ;;  %1115 = vst.msk [vmem:[%s2795_s16 + $0x2f] sm:$0x1] %vm1111_vm2, %v2790_v4  ;;  %v1167_v6 = vmul.f32 0.25, %v334_v58  ;;  %v1203_v22 = vmul.f32 0.75, %v334_v58  ;;  %v3651_v42 = vld [vmem:[#allocation8_spill] sm:$0xff] }
  0xa2   : > { %643 = vst.msk [vmem:[%s2795_s16] sm:$0xff] %vm642_vm1, %v610_v21  ;;  %1769 = vrot.lane.b32.xlu1 %v1664_v31, %s2109_s12  ;;  %1767 = vrot.lane.b32.xlu0 %v1663_v28, %s2109_s12  ;;  %v1467_v20 = vmul.f32 0.25, %v335_v18  ;;  %v1166_v39 = vmul.f32 0.25, %v333_v27  ;;  %645 = vst.msk [vmem:[%s2795_s16 + $0x20] sm:$0xff] %vm642_vm1, %v612_v24  ;;  %v2916_v49 = vsel %vm497_vm0, %v1302_v48, %v1304_v17  ;;  %v1202_v63 = vmul.f32 0.75, %v333_v27  ;;  %v3652_v51 = vld [vmem:[#allocation13_spill] sm:$0xff] }
  0xa3   : > { %1108 = vst.msk [vmem:[%s2795_s16 - $0x1] sm:$0xfe] %vm1107_vm3, %v2785_v52  ;;  %v1666_v4 = vadd.f32 %v1545_v16, %v1201_v35  ;;  %v1546_v33 = vsel %vm497_vm0, %v1543_v41, %v1545_v16  ;;  %1113 = vst.msk [vmem:[%s2795_s16 + $0x1f] sm:$0xfe] %vm1107_vm3, %v970_v61  ;;  %v1307_v5 = vrot.slane %v1203_v22, 1  ;;  %v1548_v28 = vrot.slane %v1167_v6, 1 }
  0xa4   : > { %1110 = vst.msk [vmem:[%s2795_s16 + $0x7] sm:$0xff] %vm1109_vm4, %v966_v44  ;;  %1117 = vst.msk [vmem:[%s2795_s16 + $0x47] sm:$0xff] %vm1109_vm4, %v978_v0  ;;  %v1665_v52 = vadd.f32 %v1546_v33, %v1200_v60  ;;  %v1550_v46 = vrot.slane %v1467_v20, 1  ;;  %v1306_v36 = vrot.slane %v1202_v63, 1  ;;  %v1547_v44 = vrot.slane %v1166_v39, 1  ;;  %v982_v31 = vpop.permute.xlu1 %981  ;;  %v3649_v61 = vld [vmem:[#allocation34_spill] sm:$0xff] }
  0xa5   : > { %1114 = vst.msk [vmem:[%s2795_s16 + $0x27] sm:$0xff] %vm1109_vm4, %v972_v19  ;;  %v336_v40 = vadd.f32 %v3646_v47, %v3645_v2  ;;  %v1204_v60 = vmul.f32 0.75, %v335_v18  ;;  %v338_v15 = vadd.f32 %v3650_v38, %v3649_v61  ;;  %v616_v35 = vadd.f32 %v3652_v51, %v3651_v42  ;;  %v976_v1 = vpop.permute.xlu0 %975  ;;  %v3653_v0 = vld [vmem:[#allocation39_spill] sm:$0xff]  ;;  %v3659_v51 = vld [vmem:[#allocation10_spill] sm:$0xff] }
  0xa6   : > { %1773 = vrot.lane.b32.xlu1 %v1666_v4, %s2109_s12  ;;  %1771 = vrot.lane.b32.xlu0 %v1665_v52, %s2109_s12  ;;  %v1551_v41 = vsel %vm497_vm0, %v1548_v28, %v1550_v46  ;;  %v1308_v30 = vsel %vm497_vm0, %v1306_v36, %v1307_v5  ;;  %v1549_v13 = vsel %vm497_vm0, %v1547_v44, %v1548_v28  ;;  %v2940_v58 = vmul.f32 0.25, %v337_v25  ;;  %v3656_v4 = vld [vmem:[#allocation26_spill] sm:$0xff]  ;;  %v3657_v38 = vld [vmem:[#allocation43_spill] sm:$0xff] }
  0xa7   : > { %v1668_v48 = vadd.f32 %v1551_v41, %v1203_v22  ;;  %v2936_v21 = vmul.f32 0.25, %v336_v40  ;;  %1116 = vst.msk [vmem:[%s2795_s16 + $0x3f] sm:$0xfe] %vm1107_vm3, %v976_v1  ;;  %v1406_v53 = vadd.f32 %v1308_v30, %v1166_v39  ;;  %v1667_v10 = vadd.f32 %v1549_v13, %v1202_v63  ;;  %v3654_v22 = vld [vmem:[#allocation25_spill] sm:$0xff]  ;;  %v3655_v39 = vld [vmem:[#allocation35_spill] sm:$0xff]  ;;  %v3662_v30 = vld [vmem:[#allocation32_spill] sm:$0xff] }
  0xa8   : > { %v1205_v45 = vmul.f32 0.75, %v336_v40  ;;  %649 = vst.msk [vmem:[%s2795_s16 + $0x60] sm:$0xff] %vm642_vm1, %v616_v35  ;;  %v1309_v18 = vrot.slane %v1204_v60, 1  ;;  %v1669_v12 = vadd.f32 %v1550_v46, %v1204_v60  ;;  %v1207_v54 = vmul.f32 0.75, %v338_v15  ;;  %v986_v27 = vpop.permute.xlu1 %985  ;;  %v3660_v35 = vld [vmem:[#allocation14_spill] sm:$0xff] }
  0xa9   : > { %v1552_v43 = vrot.slane %v2936_v21, 1  ;;  %1119 = vst.msk [vmem:[%s2795_s16 + $0x5f] sm:$0xfe] %vm1107_vm3, %v982_v31  ;;  %v1553_v55 = vrot.slane %v2940_v58, 1  ;;  %v1468_v24 = vmul.f32 0.25, %v338_v15  ;;  %v1206_v19 = vmul.f32 0.75, %v337_v25  ;;  %v984_v63 = vpop.permute.xlu0 %983 }
  0xaa   : > { %1777 = vrot.lane.b32.xlu1 %v1668_v48, %s2109_s12  ;;  %1775 = vrot.lane.b32.xlu0 %v1667_v10, %s2109_s12  ;;  %2014 = vst.msk [vmem:[%s2795_s16 + $0x90] sm:$0xff] %vm642_vm1, %v1406_v53  ;;  %v1311_v26 = vrot.slane %v1205_v45, 1  ;;  %v1310_v17 = vsel %vm497_vm0, %v1307_v5, %v1309_v18  ;;  %v1314_v16 = vrot.slane %v1207_v54, 1  ;;  %v340_v20 = vadd.f32 %v3654_v22, %v3653_v0  ;;  %v3658_v15 = vld [vmem:[#allocation29_spill] sm:$0xff]  ;;  %v3663_v53 = vld [vmem:[#allocation40_spill] sm:$0xff] }
  0xab   : > { %v341_v33 = vadd.f32 %v3656_v4, %v3655_v39  ;;  %v1554_v52 = vsel %vm497_vm0, %v1552_v43, %v1553_v55  ;;  %v1407_v28 = vadd.f32 %v1310_v17, %v1167_v6  ;;  %v1555_v46 = vrot.slane %v1468_v24, 1  ;;  %v3661_v48 = vld [vmem:[#allocation45_spill] sm:$0xff] }
  0xac   : > { %v1312_v36 = vrot.slane %v1206_v19, 1  ;;  %v1670_v44 = vadd.f32 %v1554_v52, %v1205_v45  ;;  %v1171_v2 = vmul.f32 0.25, %v340_v20  ;;  %v1209_v47 = vmul.f32 0.75, %v340_v20  ;;  %v990_v14 = vpop.permute.xlu1 %989  ;;  %v3664_v10 = vld [vmem:[#allocation33_spill] sm:$0xff] }
  0xad   : > { %v1469_v40 = vmul.f32 0.25, %v341_v33  ;;  %2015 = vst.msk [vmem:[%s2795_s16 + $0x98] sm:$0xff] %vm642_vm1, %v1407_v28  ;;  %v1672_v5 = vadd.f32 %v1555_v46, %v1207_v54  ;;  %v1556_v6 = vsel %vm497_vm0, %v1553_v55, %v1555_v46  ;;  %v339_v42 = vadd.f32 %v3658_v15, %v3657_v38  ;;  %v3665_v54 = vld [vmem:[#allocation50_spill] sm:$0xff]  ;;  %v3667_v24 = vld [vmem:[#allocation21_spill] sm:$0xff] }
  0xae   : > { %1779 = vrot.lane.b32.xlu0 %v1669_v12, %s2109_s12  ;;  %v2962_v11 = vsel %vm497_vm0, %v1311_v26, %v1312_v36  ;;  %v2965_v25 = vsel %vm497_vm0, %v1312_v36, %v1314_v16  ;;  %1123 = vst.msk [vmem:[%s2795_s16 + $0x87] sm:$0xff] %vm1109_vm4, %v990_v14  ;;  %1781 = vrot.lane.b32.xlu1 %v1670_v44, %s2109_s12  ;;  %v1317_v41 = vrot.slane %v1209_v47, 1  ;;  %v1558_v60 = vrot.slane %v1171_v2, 1  ;;  %v3666_v26 = vld [vmem:[#allocation38_spill] sm:$0xff] }
  0xaf   : > { %v1671_v31 = vadd.f32 %v1556_v6, %v1206_v19  ;;  %v1560_v61 = vrot.slane %v1469_v40, 1  ;;  %v617_v1 = vadd.f32 %v3660_v35, %v3659_v51  ;;  %v342_v13 = vadd.f32 %v3662_v30, %v3661_v48  ;;  %v3668_v19 = vld [vmem:[#allocation27_spill] sm:$0xff] }
  0xb0   : > { %v343_v45 = vadd.f32 %v3664_v10, %v3663_v53  ;;  %v1210_v18 = vmul.f32 0.75, %v341_v33  ;;  %v988_v12 = vpop.permute.xlu0 %987  ;;  %v344_v55 = vadd.f32 %v3666_v26, %v3665_v54  ;;  %v620_v17 = vadd.f32 %v3668_v19, %v3667_v24  ;;  %v3669_v30 = vld [vmem:[#allocation55_spill] sm:$0xff]  ;;  %v3672_v53 = vld [vmem:[#allocation42_spill] sm:$0xff]  ;;  %v3674_v54 = vld [vmem:[#allocation44_spill] sm:$0xff] }
  0xb1   : > { %v1561_v43 = vsel %vm497_vm0, %v1558_v60, %v1560_v61  ;;  %v1170_v0 = vmul.f32 0.25, %v339_v42  ;;  %v1208_v22 = vmul.f32 0.75, %v339_v42  ;;  %650 = vst.msk [vmem:[%s2795_s16 + $0x68] sm:$0xff] %vm642_vm1, %v617_v1  ;;  %v2987_v20 = vmul.f32 0.25, %v342_v13 }
  0xb2   : > { %1783 = vrot.lane.b32.xlu0 %v1671_v31, %s2109_s12  ;;  %v1674_v16 = vadd.f32 %v1561_v43, %v1209_v47  ;;  %1122 = vst.msk [vmem:[%s2795_s16 + $0x7f] sm:$0xfe] %vm1107_vm3, %v988_v12  ;;  %1785 = vrot.lane.b32.xlu1 %v1672_v5, %s2109_s12  ;;  %v2996_v39 = vmul.f32 0.25, %v343_v45  ;;  %v1211_v4 = vmul.f32 0.75, %v342_v13  ;;  %v1319_v33 = vrot.slane %v1210_v18, 1  ;;  %v3673_v12 = vld [vmem:[#allocation59_spill] sm:$0xff] }
  0xb3   : > { %1121 = vst.msk [vmem:[%s2795_s16 + $0x6f] sm:$0x1] %vm1111_vm2, %v986_v27  ;;  %v1675_v52 = vadd.f32 %v1560_v61, %v1210_v18  ;;  %v1316_v28 = vrot.slane %v1208_v22, 1  ;;  %v1557_v46 = vrot.slane %v1170_v0, 1  ;;  %v1562_v36 = vrot.slane %v2987_v20, 1  ;;  %v994_v47 = vpop.permute.xlu1 %993 }
  0xb4   : > { %1120 = vst.msk [vmem:[%s2795_s16 + $0x67] sm:$0xff] %vm1109_vm4, %v984_v63  ;;  %v1213_v44 = vmul.f32 0.75, %v344_v55  ;;  %v1321_v40 = vrot.slane %v1211_v4, 1  ;;  %v1563_v27 = vrot.slane %v2996_v39, 1  ;;  %v1320_v63 = vsel %vm497_vm0, %v1317_v41, %v1319_v33  ;;  %v992_v5 = vpop.permute.xlu0 %991 }
  0xb5   : > { %653 = vst.msk [vmem:[%s2795_s16 + $0xa0] sm:$0xff] %vm642_vm1, %v620_v17  ;;  %v1470_v14 = vmul.f32 0.25, %v344_v55  ;;  %v1318_v6 = vsel %vm497_vm0, %v1316_v28, %v1317_v41  ;;  %v1559_v31 = vsel %vm497_vm0, %v1557_v46, %v1558_v60  ;;  %v1411_v61 = vadd.f32 %v1320_v63, %v1171_v2  ;;  %v3670_v41 = vld [vmem:[#allocation41_spill] sm:$0xff]  ;;  %v3671_v60 = vld [vmem:[#allocation51_spill] sm:$0xff]  ;;  %v3675_v55 = vld [vmem:[#allocation22_spill] sm:$0xff] }
  0xb6   : > { %1125 = vst.msk [vmem:[%s2795_s16 + $0x9f] sm:$0xfe] %vm1107_vm3, %v994_v47  ;;  %v1324_v38 = vrot.slane %v1213_v44, 1  ;;  %1789 = vrot.lane.b32.xlu1 %v1674_v16, %s2109_s12  ;;  %v1410_v15 = vadd.f32 %v1318_v6, %v1170_v0  ;;  %v1673_v42 = vadd.f32 %v1559_v31, %v1208_v22  ;;  %v1564_v51 = vsel %vm497_vm0, %v1562_v36, %v1563_v27  ;;  %v3677_v46 = vld [vmem:[#allocation62_spill] sm:$0xff]  ;;  %v3678_v36 = vld [vmem:[#allocation47_spill] sm:$0xff] }
  0xb7   : > { %1124 = vst.msk [vmem:[%s2795_s16 + $0x8f] sm:$0x1] %vm1111_vm2, %v992_v5  ;;  %v1565_v35 = vrot.slane %v1470_v14, 1  ;;  %v1676_v1 = vadd.f32 %v1564_v51, %v1211_v4  ;;  %v1212_v48 = vmul.f32 0.75, %v343_v45  ;;  %v346_v13 = vadd.f32 %v3670_v41, %v3669_v30  ;;  %v998_v10 = vpop.permute.xlu1 %997  ;;  %v3676_v45 = vld [vmem:[#allocation30_spill] sm:$0xff] }
  0xb8   : > { %2019 = vst.msk [vmem:[%s2795_s16 + $0xd8] sm:$0xff] %vm642_vm1, %v1411_v61  ;;  %v347_v2 = vadd.f32 %v3672_v53, %v3671_v60  ;;  %1787 = vrot.lane.b32.xlu0 %v1673_v42, %s2109_s12  ;;  %2018 = vst.msk [vmem:[%s2795_s16 + $0xd0] sm:$0xff] %vm642_vm1, %v1410_v15  ;;  %v345_v26 = vadd.f32 %v3674_v54, %v3673_v12  ;;  %v621_v24 = vadd.f32 %v3676_v45, %v3675_v55  ;;  %v996_v19 = vpop.permute.xlu0 %995  ;;  %v3679_v15 = vld [vmem:[#allocation56_spill] sm:$0xff]  ;;  %v3680_v42 = vld [vmem:[#allocation49_spill] sm:$0xff] }
  0xb9   : > { %v1678_v43 = vadd.f32 %v1565_v35, %v1213_v44  ;;  %v1566_v18 = vsel %vm497_vm0, %v1563_v27, %v1565_v35  ;;  %v1322_v17 = vrot.slane %v1212_v48, 1  ;;  %v1175_v0 = vmul.f32 0.25, %v346_v13 }
  0xba   : > { %v1677_v16 = vadd.f32 %v1566_v18, %v1212_v48  ;;  %v1215_v22 = vmul.f32 0.75, %v346_v13  ;;  %1793 = vrot.lane.b32.xlu1 %v1676_v1, %s2109_s12  ;;  %v1471_v4 = vmul.f32 0.25, %v347_v2  ;;  %v1174_v33 = vmul.f32 0.25, %v345_v26  ;;  %654 = vst.msk [vmem:[%s2795_s16 + $0xa8] sm:$0xff] %vm642_vm1, %v621_v24  ;;  %v3681_v1 = vld [vmem:[#allocation66_spill] sm:$0xff] }
  0xbb   : > { %v1214_v28 = vmul.f32 0.75, %v345_v26  ;;  %v348_v44 = vadd.f32 %v3678_v36, %v3677_v46  ;;  %v3031_v47 = vsel %vm497_vm0, %v1321_v40, %v1322_v17  ;;  %v3034_v27 = vsel %vm497_vm0, %v1322_v17, %v1324_v38  ;;  %1127 = vst.msk [vmem:[%s2795_s16 + $0xaf] sm:$0x1] %vm1111_vm2, %v998_v10  ;;  %v3682_v48 = vld [vmem:[#allocation54_spill] sm:$0xff]  ;;  %v3683_v17 = vld [vmem:[#allocation36_spill] sm:$0xff]  ;;  %v3685_v36 = vld [vmem:[#allocation71_spill] sm:$0xff] }
  0xbc   : > { %v1327_v63 = vrot.slane %v1215_v22, 1  ;;  %v1568_v14 = vrot.slane %v1175_v0, 1  ;;  %1126 = vst.msk [vmem:[%s2795_s16 + $0xa7] sm:$0xff] %vm1109_vm4, %v996_v19  ;;  %v1002_v5 = vpop.permute.xlu1 %1001  ;;  %1791 = vrot.lane.b32.xlu0 %v1675_v52, %s2109_s12  ;;  %v1570_v6 = vrot.slane %v1471_v4, 1  ;;  %v1567_v61 = vrot.slane %v1174_v33, 1 }
  0xbd   : > { %v1326_v31 = vrot.slane %v1214_v28, 1  ;;  %v349_v51 = vadd.f32 %v3680_v42, %v3679_v15  ;;  %1129 = vst.msk [vmem:[%s2795_s16 + $0xc7] sm:$0xff] %vm1109_vm4, %v1002_v5  ;;  %v3045_v40 = vmul.f32 0.25, %v348_v44  ;;  %v1217_v38 = vmul.f32 0.75, %v348_v44  ;;  %v3686_v44 = vld [vmem:[#allocation57_spill] sm:$0xff]  ;;  %v3687_v5 = vld [vmem:[#allocation67_spill] sm:$0xff] }
  0xbe   : > { %v1216_v35 = vmul.f32 0.75, %v347_v2  ;;  %v350_v30 = vadd.f32 %v3682_v48, %v3681_v1  ;;  %1797 = vrot.lane.b32.xlu1 %v1678_v43, %s2109_s12  ;;  %v1571_v52 = vsel %vm497_vm0, %v1568_v14, %v1570_v6  ;;  %v1569_v13 = vsel %vm497_vm0, %v1567_v61, %v1568_v14 }
  0xbf   : > { %v1328_v41 = vsel %vm497_vm0, %v1326_v31, %v1327_v63  ;;  %v3053_v60 = vmul.f32 0.25, %v349_v51  ;;  %v1000_v53 = vpop.permute.xlu0 %999  ;;  %v1680_v10 = vadd.f32 %v1571_v52, %v1215_v22  ;;  %v1679_v12 = vadd.f32 %v1569_v13, %v1214_v28  ;;  %v3684_v22 = vld [vmem:[#allocation46_spill] sm:$0xff]  ;;  %v3690_v52 = vld [vmem:[#allocation60_spill] sm:$0xff]  ;;  %v3691_v13 = vld [vmem:[#allocation37_spill] sm:$0xff] }
  0xc0   : > { %v1414_v18 = vadd.f32 %v1328_v41, %v1174_v33  ;;  %v1331_v54 = vrot.slane %v1217_v38, 1  ;;  %1128 = vst.msk [vmem:[%s2795_s16 + $0xbf] sm:$0xfe] %vm1107_vm3, %v1000_v53  ;;  %1795 = vrot.lane.b32.xlu0 %v1677_v16, %s2109_s12  ;;  %v1572_v2 = vrot.slane %v3045_v40, 1  ;;  %v1329_v26 = vrot.slane %v1216_v35, 1  ;;  %v3692_v53 = vld [vmem:[#allocation48_spill] sm:$0xff] }
  0xc1   : > { %v1573_v43 = vrot.slane %v3053_v60, 1  ;;  %v1681_v55 = vadd.f32 %v1570_v6, %v1216_v35  ;;  %v1219_v45 = vmul.f32 0.75, %v350_v30  ;;  %v1472_v24 = vmul.f32 0.25, %v350_v30  ;;  %v3688_v6 = vld [vmem:[#allocation58_spill] sm:$0xff] }
  0xc2   : > { %2022 = vst.msk [vmem:[%s2795_s16 + $0x110] sm:$0xff] %vm642_vm1, %v1414_v18  ;;  %v1218_v19 = vmul.f32 0.75, %v349_v51  ;;  %v624_v4 = vadd.f32 %v3684_v22, %v3683_v17  ;;  %v1006_v33 = vpop.permute.xlu1 %1005  ;;  %1801 = vrot.lane.b32.xlu1 %v1680_v10, %s2109_s12  ;;  %v1330_v28 = vsel %vm497_vm0, %v1327_v63, %v1329_v26  ;;  %v352_v14 = vadd.f32 %v3686_v44, %v3685_v36  ;;  %v3697_v44 = vld [vmem:[#allocation82_spill] sm:$0xff] }
  0xc3   : > { %v1574_v16 = vsel %vm497_vm0, %v1572_v2, %v1573_v43  ;;  %v1004_v46 = vpop.permute.xlu0 %1003  ;;  %v353_v31 = vadd.f32 %v3688_v6, %v3687_v5  ;;  %v1415_v15 = vadd.f32 %v1330_v28, %v1175_v0  ;;  %v1334_v42 = vrot.slane %v1219_v45, 1  ;;  %v3695_v28 = vld [vmem:[#allocation72_spill] sm:$0xff] }
  0xc4   : > { %v1682_v61 = vadd.f32 %v1574_v16, %v1217_v38  ;;  %v1575_v51 = vrot.slane %v1472_v24, 1  ;;  %657 = vst.msk [vmem:[%s2795_s16 + $0xe0] sm:$0xff] %vm642_vm1, %v624_v4  ;;  %1799 = vrot.lane.b32.xlu0 %v1679_v12, %s2109_s12  ;;  %v1332_v35 = vrot.slane %v1218_v19, 1  ;;  %v1179_v63 = vmul.f32 0.25, %v352_v14  ;;  %v3689_v38 = vld [vmem:[#allocation75_spill] sm:$0xff] }
  0xc5   : > { %1130 = vst.msk [vmem:[%s2795_s16 + $0xcf] sm:$0x1] %vm1111_vm2, %v1004_v46  ;;  %v1221_v1 = vmul.f32 0.75, %v352_v14  ;;  %v1473_v48 = vmul.f32 0.25, %v353_v31  ;;  %v351_v41 = vadd.f32 %v3690_v52, %v3689_v38  ;;  %v625_v10 = vadd.f32 %v3692_v53, %v3691_v13  ;;  %v3698_v14 = vld [vmem:[#allocation70_spill] sm:$0xff] }
  0xc6   : > { %1131 = vst.msk [vmem:[%s2795_s16 + $0xdf] sm:$0xfe] %vm1107_vm3, %v1006_v33  ;;  %v1684_v30 = vadd.f32 %v1575_v51, %v1219_v45  ;;  %v1576_v0 = vsel %vm497_vm0, %v1573_v43, %v1575_v51  ;;  %v1010_v18 = vpop.permute.xlu1 %1009  ;;  %1805 = vrot.lane.b32.xlu1 %v1682_v61, %s2109_s12  ;;  %v3087_v12 = vsel %vm497_vm0, %v1331_v54, %v1332_v35  ;;  %v1578_v24 = vrot.slane %v1179_v63, 1  ;;  %v3693_v54 = vld [vmem:[#allocation78_spill] sm:$0xff]  ;;  %v3694_v33 = vld [vmem:[#allocation64_spill] sm:$0xff]  ;;  %v3700_v51 = vld [vmem:[#allocation61_spill] sm:$0xff] }
  0xc7   : > { %2023 = vst.msk [vmem:[%s2795_s16 + $0x118] sm:$0xff] %vm642_vm1, %v1415_v15  ;;  %v3090_v2 = vsel %vm497_vm0, %v1332_v35, %v1334_v42  ;;  %v1683_v26 = vadd.f32 %v1576_v0, %v1218_v19  ;;  %v1337_v45 = vrot.slane %v1221_v1, 1  ;;  %v1008_v43 = vpop.permute.xlu0 %1007  ;;  %v1580_v17 = vrot.slane %v1473_v48, 1  ;;  %658 = vst.msk [vmem:[%s2795_s16 + $0xe8] sm:$0xff] %vm642_vm1, %v625_v10  ;;  %v3696_v19 = vld [vmem:[#allocation65_spill] sm:$0xff]  ;;  %v3699_v42 = vld [vmem:[#allocation52_spill] sm:$0xff] }
  0xc8   : > { %v1178_v22 = vmul.f32 0.25, %v351_v41  ;;  %v1220_v4 = vmul.f32 0.75, %v351_v41  ;;  %1803 = vrot.lane.b32.xlu0 %v1681_v55, %s2109_s12  ;;  %1133 = vst.msk [vmem:[%s2795_s16 + $0xef] sm:$0x1] %vm1111_vm2, %v1010_v18  ;;  %v354_v16 = vadd.f32 %v3694_v33, %v3693_v54  ;;  %v355_v46 = vadd.f32 %v3696_v19, %v3695_v28  ;;  %v3703_v19 = vld [vmem:[#allocation85_spill] sm:$0xff] }
  0xc9   : > { %1132 = vst.msk [vmem:[%s2795_s16 + $0xe7] sm:$0xff] %vm1109_vm4, %v1008_v43  ;;  %v1222_v36 = vmul.f32 0.75, %v353_v31  ;;  %v356_v5 = vadd.f32 %v3698_v14, %v3697_v44  ;;  %v1581_v6 = vsel %vm497_vm0, %v1578_v24, %v1580_v17  ;;  %v628_v35 = vadd.f32 %v3700_v51, %v3699_v42 }
  0xca   : > { %v1336_v61 = vrot.slane %v1220_v4, 1  ;;  %v1577_v55 = vrot.slane %v1178_v22, 1  ;;  %v1014_v15 = vpop.permute.xlu1 %1013  ;;  %1809 = vrot.lane.b32.xlu1 %v1684_v30, %s2109_s12  ;;  %v1686_v48 = vadd.f32 %v1581_v6, %v1221_v1  ;;  %v3109_v0 = vmul.f32 0.25, %v354_v16 }
  0xcb   : > { %v3111_v38 = vmul.f32 0.25, %v355_v46  ;;  %v1223_v31 = vmul.f32 0.75, %v354_v16  ;;  %1135 = vst.msk [vmem:[%s2795_s16 + $0x107] sm:$0xff] %vm1109_vm4, %v1014_v15  ;;  %v1339_v13 = vrot.slane %v1222_v36, 1  ;;  %v1687_v53 = vadd.f32 %v1580_v17, %v1222_v36  ;;  %v3704_v36 = vld [vmem:[#allocation74_spill] sm:$0xff] }
  0xcc   : > { %v1338_v52 = vsel %vm497_vm0, %v1336_v61, %v1337_v45  ;;  %v1579_v41 = vsel %vm497_vm0, %v1577_v55, %v1578_v24  ;;  %661 = vst.msk [vmem:[%s2795_s16 + $0x120] sm:$0xff] %vm642_vm1, %v628_v35  ;;  %1807 = vrot.lane.b32.xlu0 %v1683_v26, %s2109_s12  ;;  %v1582_v18 = vrot.slane %v3109_v0, 1  ;;  %v1012_v43 = vpop.permute.xlu0 %1011  ;;  %v1225_v24 = vmul.f32 0.75, %v356_v5  ;;  %v3706_v55 = vld [vmem:[#allocation76_spill] sm:$0xff] }
  0xcd   : > { %v1418_v1 = vadd.f32 %v1338_v52, %v1178_v22  ;;  %v1685_v30 = vadd.f32 %v1579_v41, %v1220_v4  ;;  %v1341_v10 = vrot.slane %v1223_v31, 1  ;;  %v1583_v54 = vrot.slane %v3111_v38, 1  ;;  %1134 = vst.msk [vmem:[%s2795_s16 + $0xff] sm:$0xfe] %vm1107_vm3, %v1012_v43  ;;  %v3701_v22 = vld [vmem:[#allocation87_spill] sm:$0xff]  ;;  %v3702_v4 = vld [vmem:[#allocation73_spill] sm:$0xff] }
  0xce   : > { %v1340_v33 = vsel %vm497_vm0, %v1337_v45, %v1339_v13  ;;  %v1474_v16 = vmul.f32 0.25, %v356_v5  ;;  %1813 = vrot.lane.b32.xlu1 %v1686_v48, %s2109_s12  ;;  %v1224_v17 = vmul.f32 0.75, %v355_v46  ;;  %v358_v28 = vadd.f32 %v3702_v4, %v3701_v22  ;;  %v3705_v5 = vld [vmem:[#allocation90_spill] sm:$0xff]  ;;  %v3708_v22 = vld [vmem:[#allocation63_spill] sm:$0xff] }
  0xcf   : > { %2026 = vst.msk [vmem:[%s2795_s16 + $0x150] sm:$0xff] %vm642_vm1, %v1418_v1  ;;  %v1419_v26 = vadd.f32 %v1340_v33, %v1179_v63  ;;  %v359_v44 = vadd.f32 %v3704_v36, %v3703_v19  ;;  %v1584_v45 = vsel %vm497_vm0, %v1582_v18, %v1583_v54  ;;  %v1344_v14 = vrot.slane %v1225_v24, 1 }
  0xd0   : > { %v1585_v6 = vrot.slane %v1474_v16, 1  ;;  %v1018_v61 = vpop.permute.xlu1 %1017  ;;  %v357_v15 = vadd.f32 %v3706_v55, %v3705_v5  ;;  %1811 = vrot.lane.b32.xlu0 %v1685_v30, %s2109_s12  ;;  %v1688_v42 = vadd.f32 %v1584_v45, %v1223_v31  ;;  %v1342_v63 = vrot.slane %v1224_v17, 1  ;;  %v1016_v46 = vpop.permute.xlu0 %1015 }
  0xd1   : > { %2027 = vst.msk [vmem:[%s2795_s16 + $0x158] sm:$0xff] %vm642_vm1, %v1419_v26  ;;  %v1183_v51 = vmul.f32 0.25, %v358_v28  ;;  %v1227_v35 = vmul.f32 0.75, %v358_v28  ;;  %v1475_v41 = vmul.f32 0.25, %v359_v44  ;;  %v3707_v26 = vld [vmem:[#allocation53_spill] sm:$0xff]  ;;  %v1228_v45 = vmul.f32 0.75, %v359_v44 }
  0xd2   : > { %1137 = vst.msk [vmem:[%s2795_s16 + $0x11f] sm:$0xfe] %vm1107_vm3, %v1018_v61  ;;  %v1690_v48 = vadd.f32 %v1585_v6, %v1225_v24  ;;  %v1586_v52 = vsel %vm497_vm0, %v1583_v54, %v1585_v6  ;;  %v1182_v13 = vmul.f32 0.25, %v357_v15  ;;  %1817 = vrot.lane.b32.xlu1 %v1688_v42, %s2109_s12  ;;  %v3145_v1 = vsel %vm497_vm0, %v1341_v10, %v1342_v63  ;;  %v3709_v10 = vld [vmem:[#allocation79_spill] sm:$0xff] }
  0xd3   : > { %1136 = vst.msk [vmem:[%s2795_s16 + $0x10f] sm:$0x1] %vm1111_vm2, %v1016_v46  ;;  %v3148_v31 = vsel %vm497_vm0, %v1342_v63, %v1344_v14  ;;  %v1689_v30 = vadd.f32 %v1586_v52, %v1224_v17  ;;  %v1347_v18 = vrot.slane %v1227_v35, 1  ;;  %v1588_v43 = vrot.slane %v1183_v51, 1  ;;  %v3710_v17 = vld [vmem:[#allocation81_spill] sm:$0xff] }
  0xd4   : > { %v1590_v33 = vrot.slane %v1475_v41, 1  ;;  %v1226_v16 = vmul.f32 0.75, %v357_v15  ;;  %v1587_v24 = vrot.slane %v1182_v13, 1  ;;  %v1022_v54 = vpop.permute.xlu1 %1021  ;;  %1815 = vrot.lane.b32.xlu0 %v1687_v53, %s2109_s12  ;;  %v629_v4 = vadd.f32 %v3708_v22, %v3707_v26  ;;  %v3711_v53 = vld [vmem:[#allocation86_spill] sm:$0xff]  ;;  %v168_v26 = vld [vmem:[%s2134_s11 + $0x198] sm:$0xff]  ;;  %v3712_v22 = vld [vmem:[#allocation68_spill] sm:$0xff] }
  0xd5   : > { %v1020_v28 = vpop.permute.xlu0 %1019  ;;  %v360_v19 = vadd.f32 %v3709_v10, %v2678_v56  ;;  %v361_v36 = vadd.f32 %v3710_v17, %v2650_v32  ;;  %v362_v5 = vadd.f32 %v3711_v53, %v2697_v37  ;;  %v1349_v37 = vrot.slane %v1228_v45, 1  ;;  %v3715_v53 = vld [vmem:[#allocation69_spill] sm:$0xff] }
  0xd6   : > { %v1591_v14 = vsel %vm497_vm0, %v1588_v43, %v1590_v33  ;;  %v1346_v6 = vrot.slane %v1226_v16, 1  ;;  %v1589_v61 = vsel %vm497_vm0, %v1587_v24, %v1588_v43  ;;  %1821 = vrot.lane.b32.xlu1 %v1690_v48, %s2109_s12  ;;  %662 = vst.msk [vmem:[%s2795_s16 + $0x128] sm:$0xff] %vm642_vm1, %v629_v4  ;;  %v1693_v63 = vadd.f32 %v1590_v33, %v1228_v45  ;;  %v3713_v4 = vld [vmem:[#allocation77_spill] sm:$0xff] }
  0xd7   : > { %v1692_v55 = vadd.f32 %v1591_v14, %v1227_v35  ;;  %v1691_v15 = vadd.f32 %v1589_v61, %v1226_v16  ;;  %v3164_v42 = vmul.f32 0.25, %v360_v19  ;;  %v3166_v56 = vmul.f32 0.25, %v361_v36  ;;  %1139 = vst.msk [vmem:[%s2795_s16 + $0x12f] sm:$0x1] %vm1111_vm2, %v1022_v54 }
  0xd8   : > { %v1348_v32 = vsel %vm497_vm0, %v1346_v6, %v1347_v18  ;;  %1138 = vst.msk [vmem:[%s2795_s16 + $0x127] sm:$0xff] %vm1109_vm4, %v1020_v28  ;;  %v1229_v44 = vmul.f32 0.75, %v360_v19  ;;  %1819 = vrot.lane.b32.xlu0 %v1689_v30, %s2109_s12  ;;  %v1231_v52 = vmul.f32 0.75, %v362_v5  ;;  %v1350_v43 = vsel %vm497_vm0, %v1347_v18, %v1349_v37  ;;  %v2100_v6 = vld [vmem:[%s2134_s11 + $0x180] sm:$0xff]  ;;  %v170_v37 = vld [vmem:[%s2134_s11 + $0x1a8] sm:$0x3] }
  0xd9   : > { %v1422_v46 = vadd.f32 %v1348_v32, %v1182_v13  ;;  %v1592_v35 = vrot.slane %v3164_v42, 1  ;;  %v1593_v48 = vrot.slane %v3166_v56, 1  ;;  %v1026_v16 = vpop.permute.xlu1 %1025  ;;  %v1476_v24 = vmul.f32 0.25, %v362_v5  ;;  %v3716_v5 = vld [vmem:[#allocation80_spill] sm:$0xff]  ;;  %v169_v32 = vld [vmem:[%s2134_s11 + $0x1a0] sm:$0xff] }
  0xda   : > { %v1351_v41 = vrot.slane %v1229_v44, 1  ;;  %v1230_v54 = vmul.f32 0.75, %v361_v36  ;;  %1825 = vrot.lane.b32.xlu1 %v1692_v55, %s2109_s12  ;;  %v1423_v30 = vadd.f32 %v1350_v43, %v1183_v51  ;;  %1141 = vst.msk [vmem:[%s2795_s16 + $0x147] sm:$0xff] %vm1109_vm4, %v1026_v16  ;;  %v1024_v33 = vpop.permute.xlu0 %1023  ;;  %v1354_v18 = vrot.slane %v1231_v52, 1  ;;  %v2099_v36 = vld [vmem:[%s2134_s11 + $0x188] sm:$0xff]  ;;  %v3714_v51 = vld [vmem:[#allocation89_spill] sm:$0xff] }
  0xdb   : > { %2030 = vst.msk [vmem:[%s2795_s16 + $0x190] sm:$0xff] %vm642_vm1, %v1422_v46  ;;  %v1594_v13 = vsel %vm497_vm0, %v1592_v35, %v1593_v48  ;;  %v632_v28 = vadd.f32 %v3713_v4, %v3712_v22  ;;  %v1595_v19 = vrot.slane %v1476_v24, 1  ;;  %v316_v45 = vmul.f32 0.25, %v2099_v36  ;;  %v3718_v22 = vld [vmem:[#allocation91_spill] sm:$0xff]  ;;  %v3720_v36 = vld [vmem:[#allocation94_spill] sm:$0xff] }
  0xdc   : > { %v1694_v10 = vadd.f32 %v1594_v13, %v1229_v44  ;;  %1140 = vst.msk [vmem:[%s2795_s16 + $0x13f] sm:$0xfe] %vm1107_vm3, %v1024_v33  ;;  %v1352_v17 = vrot.slane %v1230_v54, 1  ;;  %1823 = vrot.lane.b32.xlu0 %v1691_v15, %s2109_s12  ;;  %v365_v14 = vadd.f32 %v2715_v59, %v3714_v51  ;;  %v315_v61 = vmul.f32 0.25, %v2100_v6  ;;  %v3717_v13 = vld [vmem:[#allocation88_spill] sm:$0xff] }
  0xdd   : > { %2031 = vst.msk [vmem:[%s2795_s16 + $0x198] sm:$0xff] %vm642_vm1, %v1423_v30  ;;  %665 = vst.msk [vmem:[%s2795_s16 + $0x160] sm:$0xff] %vm642_vm1, %v632_v28  ;;  %v633_v55 = vadd.f32 %v3716_v5, %v3715_v53  ;;  %v318_v44 = vmul.f32 0.25, %v168_v26  ;;  %v1696_v46 = vadd.f32 %v1595_v19, %v1231_v52  ;;  %v1596_v59 = vsel %vm497_vm0, %v1593_v48, %v1595_v19 }
  0xde   : > { %v3202_v15 = vsel %vm497_vm0, %v1351_v41, %v1352_v17  ;;  %v3205_v35 = vsel %vm497_vm0, %v1352_v17, %v1354_v18  ;;  %1829 = vrot.lane.b32.xlu1 %v1694_v10, %s2109_s12  ;;  %v1695_v43 = vadd.f32 %v1596_v59, %v1230_v54  ;;  %v1028_v24 = vpop.permute.xlu0 %1027  ;;  %v364_v30 = vadd.f32 %v316_v45, %v3717_v13  ;;  %v3719_v41 = vld [vmem:[#allocation93_spill] sm:$0xff] }
  0xdf   : > { %v1030_v16 = vpop.permute.xlu1 %1029  ;;  %v1477_v33 = vmul.f32 0.25, %v365_v14  ;;  %v363_v26 = vadd.f32 %v315_v61, %v3718_v22  ;;  %666 = vst.msk [vmem:[%s2795_s16 + $0x168] sm:$0xff] %vm642_vm1, %v633_v55  ;;  %v319_v52 = vmul.f32 0.25, %v169_v32  ;;  %v366_v18 = vadd.f32 %v318_v44, %v3719_v41 }
  0xe0   : > { %1143 = vst.msk [vmem:[%s2795_s16 + $0x15f] sm:$0xfe] %vm1107_vm3, %v1030_v16  ;;  %v1234_v48 = vmul.f32 0.75, %v365_v14  ;;  %v320_v4 = vmul.f32 0.25, %v170_v37  ;;  %1827 = vrot.lane.b32.xlu0 %v1693_v63, %s2109_s12  ;;  %v1187_v54 = vmul.f32 0.25, %v364_v30  ;;  %v1233_v28 = vmul.f32 0.75, %v364_v30 }
  0xe1   : > { %1142 = vst.msk [vmem:[%s2795_s16 + $0x14f] sm:$0x1] %vm1111_vm2, %v1028_v24  ;;  %v1600_v10 = vrot.slane %v1477_v33, 1  ;;  %v1186_v19 = vmul.f32 0.25, %v363_v26  ;;  %v1232_v17 = vmul.f32 0.75, %v363_v26  ;;  %v367_v45 = vadd.f32 %v319_v52, %v3720_v36 }
  0xe2   : > { %v3220_v51 = vmul.f32 0.25, %v366_v18  ;;  %v1235_v6 = vmul.f32 0.75, %v366_v18  ;;  %1833 = vrot.lane.b32.xlu1 %v1696_v46, %s2109_s12  ;;  %v1357_v61 = vrot.slane %v1233_v28, 1  ;;  %v1598_v53 = vrot.slane %v1187_v54, 1 }
  0xe3   : > { %v1597_v5 = vrot.slane %v1186_v19, 1  ;;  %v1359_v14 = vrot.slane %v1234_v48, 1  ;;  %v1356_v55 = vrot.slane %v1232_v17, 1  ;;  %v3223_v32 = vmul.f32 0.25, %v367_v45 }
  0xe4   : > { %v1034_v63 = vpop.permute.xlu1 %1033  ;;  %v1361_v44 = vrot.slane %v1235_v6, 1  ;;  %v1602_v37 = vrot.slane %v3220_v51, 1  ;;  %1831 = vrot.lane.b32.xlu0 %v1695_v43, %s2109_s12  ;;  %v1601_v59 = vsel %vm497_vm0, %v1598_v53, %v1600_v10  ;;  %v1699_v13 = vadd.f32 %v1600_v10, %v1234_v48  ;;  %v3721_v10 = vld [vmem:[#allocation83_spill] sm:$0xff] }
  0xe5   : > { %v1599_v16 = vsel %vm497_vm0, %v1597_v5, %v1598_v53  ;;  %1145 = vst.msk [vmem:[%s2795_s16 + $0x16f] sm:$0x1] %vm1111_vm2, %v1034_v63  ;;  %v1032_v46 = vpop.permute.xlu0 %1031  ;;  %v1360_v24 = vsel %vm497_vm0, %v1357_v61, %v1359_v14  ;;  %v1698_v30 = vadd.f32 %v1601_v59, %v1233_v28  ;;  %v1358_v33 = vsel %vm497_vm0, %v1356_v55, %v1357_v61  ;;  %v3723_v61 = vld [vmem:[#allocation84_spill] sm:$0xff]  ;;  %v3724_v53 = vld [vmem:[#allocation95_spill] sm:$0xff] }
  0xe6   : > { %v1697_v22 = vadd.f32 %v1599_v16, %v1232_v17  ;;  %1144 = vst.msk [vmem:[%s2795_s16 + $0x167] sm:$0xff] %vm1109_vm4, %v1032_v46  ;;  %v1603_v43 = vrot.slane %v3223_v32, 1  ;;  %v1426_v26 = vadd.f32 %v1358_v33, %v1186_v19  ;;  %v1427_v52 = vadd.f32 %v1360_v24, %v1187_v54  ;;  %v3722_v17 = vld [vmem:[#allocation92_spill] sm:$0xff] }
  0xe7   : > { %v368_v41 = vadd.f32 %v320_v4, %v2699_v7  ;;  %v1236_v18 = vmul.f32 0.75, %v367_v45  ;;  %1837 = vrot.lane.b32.xlu1 %v1698_v30, %s2109_s12  ;;  %v636_v36 = vadd.f32 %v3722_v17, %v3721_v10  ;;  %v637_v5 = vadd.f32 %v3724_v53, %v3723_v61  ;;  %v3725_v19 = vld [vmem:[#allocation96_spill] sm:$0xff] }
  0xe8   : > { %v1604_v48 = vsel %vm497_vm0, %v1602_v37, %v1603_v43  ;;  %v1038_v28 = vpop.permute.xlu1 %1037  ;;  %v640_v54 = vadd.f32 %v2726_v50, %v3725_v19  ;;  %1835 = vrot.lane.b32.xlu0 %v1697_v22, %s2109_s12  ;;  %2034 = vst.msk [vmem:[%s2795_s16 + $0x1d0] sm:$0xff] %vm642_vm1, %v1426_v26  ;;  %2035 = vst.msk [vmem:[%s2795_s16 + $0x1d8] sm:$0xff] %vm642_vm1, %v1427_v52  ;;  %v3726_v50 = vld [vmem:[#allocation97_spill] sm:$0xff]  ;;  %v1400_v63 = vadd.f32 %v2780_v23, %v2745_v8 }
  0xe9   : > { %v1700_v7 = vadd.f32 %v1604_v48, %v1235_v6  ;;  %1147 = vst.msk [vmem:[%s2795_s16 + $0x187] sm:$0xff] %vm1109_vm4, %v1038_v28  ;;  %v1036_v4 = vpop.permute.xlu0 %1035  ;;  %v1237_v45 = vmul.f32 0.75, %v368_v41  ;;  %v1478_v14 = vmul.f32 0.25, %v368_v41  ;;  %v1362_v55 = vrot.slane %v1236_v18, 1 }
  0xea   : > { %1146 = vst.msk [vmem:[%s2795_s16 + $0x17f] sm:$0xfe] %vm1107_vm3, %v1036_v4  ;;  %v641_v6 = vadd.f32 %v2732_v57, %v3726_v50  ;;  %v1401_v37 = vadd.f32 %v2783_v34, %v2747_v9  ;;  %v1404_v59 = vadd.f32 %v2897_v29, %v2797_v3  ;;  %v1405_v30 = vadd.f32 %v2916_v49, %v2804_v62 }
  0xeb   : > { %669 = vst.msk [vmem:[%s2795_s16 + $0x1a0] sm:$0xff] %vm642_vm1, %v636_v36  ;;  %670 = vst.msk [vmem:[%s2795_s16 + $0x1a8] sm:$0xff] %vm642_vm1, %v637_v5  ;;  %v1364_v16 = vrot.slane %v1237_v45, 1  ;;  %v1605_v46 = vrot.slane %v1478_v14, 1  ;;  %v1363_v24 = vsel %vm497_vm0, %v1361_v44, %v1362_v55  ;;  %1841 = vrot.lane.b32.xlu1 %v1700_v7, %s2109_s12  ;;  %v1408_v57 = vadd.f32 %v2962_v11, %v2936_v21 }
  0xec   : > { %673 = vst.msk [vmem:[%s2795_s16 + $0x1e0] sm:$0xff] %vm642_vm1, %v640_v54  ;;  %674 = vst.msk [vmem:[%s2795_s16 + $0x1e8] sm:$0xff] %vm642_vm1, %v641_v6  ;;  %v1409_v8 = vadd.f32 %v2965_v25, %v2940_v58  ;;  %v1412_v9 = vadd.f32 %v3031_v47, %v2987_v20  ;;  %v1413_v23 = vadd.f32 %v3034_v27, %v2996_v39  ;;  %1839 = vrot.lane.b32.xlu0 %v1699_v13, %s2109_s12 }
  0xed   : > { %2008 = vst.msk [vmem:[%s2795_s16 + $0x30] sm:$0xff] %vm642_vm1, %v1400_v63  ;;  %2009 = vst.msk [vmem:[%s2795_s16 + $0x38] sm:$0xff] %vm642_vm1, %v1401_v37  ;;  %v1702_v34 = vadd.f32 %v1605_v46, %v1237_v45  ;;  %v1365_v3 = vsel %vm497_vm0, %v1362_v55, %v1364_v16  ;;  %v1606_v62 = vsel %vm497_vm0, %v1603_v43, %v1605_v46  ;;  %v1040_v29 = vpop.permute.xlu0 %1039 }
  0xee   : > { %2012 = vst.msk [vmem:[%s2795_s16 + $0x70] sm:$0xff] %vm642_vm1, %v1404_v59  ;;  %2013 = vst.msk [vmem:[%s2795_s16 + $0x78] sm:$0xff] %vm642_vm1, %v1405_v30  ;;  %v1416_v49 = vadd.f32 %v3087_v12, %v3045_v40  ;;  %v1701_v21 = vadd.f32 %v1606_v62, %v1236_v18  ;;  %v1042_v58 = vpop.permute.xlu1 %1041  ;;  %v1417_v11 = vadd.f32 %v3090_v2, %v3053_v60 }
  0xef   : > { %1148 = vst.msk [vmem:[%s2795_s16 + $0x18f] sm:$0x1] %vm1111_vm2, %v1040_v29  ;;  %v1420_v25 = vadd.f32 %v3145_v1, %v3109_v0  ;;  %v1421_v20 = vadd.f32 %v3148_v31, %v3111_v38  ;;  %v1424_v39 = vadd.f32 %v3202_v15, %v3164_v42  ;;  %v1425_v47 = vadd.f32 %v3205_v35, %v3166_v56 }
  0xf0   : > { %2016 = vst.msk [vmem:[%s2795_s16 + $0xb0] sm:$0xff] %vm642_vm1, %v1408_v57  ;;  %2017 = vst.msk [vmem:[%s2795_s16 + $0xb8] sm:$0xff] %vm642_vm1, %v1409_v8  ;;  %v1428_v27 = vadd.f32 %v1363_v24, %v3220_v51  ;;  %v1429_v40 = vadd.f32 %v1365_v3, %v3223_v32  ;;  %1845 = vrot.lane.b32.xlu1 %v1702_v34, %s2109_s12  ;;  %1843 = vrot.lane.b32.xlu0 %v1701_v21, %s2109_s12 }
  0xf1   : > { %2020 = vst.msk [vmem:[%s2795_s16 + $0xf0] sm:$0xff] %vm642_vm1, %v1412_v9  ;;  %2021 = vst.msk [vmem:[%s2795_s16 + $0xf8] sm:$0xff] %vm642_vm1, %v1413_v23 }
  0xf2   : > { %1149 = vst.msk [vmem:[%s2795_s16 + $0x19f] sm:$0xfe] %vm1107_vm3, %v1042_v58  ;;  %v1046_v60 = vpop.permute.xlu1 %1045 }
  0xf3   : > { %2024 = vst.msk [vmem:[%s2795_s16 + $0x130] sm:$0xff] %vm642_vm1, %v1416_v49  ;;  %2025 = vst.msk [vmem:[%s2795_s16 + $0x138] sm:$0xff] %vm642_vm1, %v1417_v11  ;;  %v1044_v12 = vpop.permute.xlu0 %1043 }
  0xf4   : > { %2028 = vst.msk [vmem:[%s2795_s16 + $0x170] sm:$0xff] %vm642_vm1, %v1420_v25  ;;  %2029 = vst.msk [vmem:[%s2795_s16 + $0x178] sm:$0xff] %vm642_vm1, %v1421_v20 }
  0xf5   : > { %2032 = vst.msk [vmem:[%s2795_s16 + $0x1b0] sm:$0xff] %vm642_vm1, %v1424_v39  ;;  %2033 = vst.msk [vmem:[%s2795_s16 + $0x1b8] sm:$0xff] %vm642_vm1, %v1425_v47 }
  0xf6   : > { %2036 = vst.msk [vmem:[%s2795_s16 + $0x1f0] sm:$0xff] %vm642_vm1, %v1428_v27  ;;  %2037 = vst.msk [vmem:[%s2795_s16 + $0x1f8] sm:$0xff] %vm642_vm1, %v1429_v40  ;;  %v1050_v2 = vpop.permute.xlu1 %1049 }
  0xf7   : > { %1151 = vst.msk [vmem:[%s2795_s16 + $0x1af] sm:$0x1] %vm1111_vm2, %v1046_v60  ;;  %v1048_v0 = vpop.permute.xlu0 %1047 }
  0xf8   : > { %1150 = vst.msk [vmem:[%s2795_s16 + $0x1a7] sm:$0xff] %vm1109_vm4, %v1044_v12  ;;  %1153 = vst.msk [vmem:[%s2795_s16 + $0x1c7] sm:$0xff] %vm1109_vm4, %v1050_v2 }
  0xf9   : > { %1152 = vst.msk [vmem:[%s2795_s16 + $0x1bf] sm:$0xfe] %vm1107_vm3, %v1048_v0 }
  0xfb   : > { %v1052_v38 = vpop.permute.xlu0 %1051 }
  0xfc   : > { %v1054_v1 = vpop.permute.xlu1 %1053  ;;  %1154 = vst.msk [vmem:[%s2795_s16 + $0x1cf] sm:$0x1] %vm1111_vm2, %v1052_v38 }
  0xfd   : > { %1155 = vst.msk [vmem:[%s2795_s16 + $0x1df] sm:$0xfe] %vm1107_vm3, %v1054_v1 }
  0xff   : > { %v1056_v31 = vpop.permute.xlu0 %1055 }
 0x100   : > { %v1058_v42 = vpop.permute.xlu1 %1057  ;;  %1156 = vst.msk [vmem:[%s2795_s16 + $0x1e7] sm:$0xff] %vm1109_vm4, %v1056_v31 }
 0x101   : > { %1157 = vst.msk [vmem:[%s2795_s16 + $0x1ef] sm:$0x1] %vm1111_vm2, %v1058_v42 }
 0x104   : > { %v1754_v56 = vpop.permute.xlu1 %1753  ;;  %v1752_v15 = vpop.permute.xlu0 %1751 }
 0x105   : > { %2039 = vst.msk [vmem:[%s2795_s16 + $0x17] sm:$0xff] %vm1109_vm4, %v1754_v56 }
 0x106   : > { %2038 = vst.msk [vmem:[%s2795_s16 + $0xf] sm:$0xfe] %vm1107_vm3, %v1752_v15 }
 0x108   : > { %v1758_v35 = vpop.permute.xlu1 %1757  ;;  %v1756_v51 = vpop.permute.xlu0 %1755 }
 0x109   : > { %2041 = vst.msk [vmem:[%s2795_s16 + $0x2f] sm:$0xfe] %vm1107_vm3, %v1758_v35 }
 0x10a   : > { %2040 = vst.msk [vmem:[%s2795_s16 + $0x1f] sm:$0x1] %vm1111_vm2, %v1756_v51 }
 0x10c   : > { %v1762_v32 = vpop.permute.xlu1 %1761  ;;  %v1760_v44 = vpop.permute.xlu0 %1759 }
 0x10d   : > { %2043 = vst.msk [vmem:[%s2795_s16 + $0x3f] sm:$0x1] %vm1111_vm2, %v1762_v32 }
 0x10e   : > { %2042 = vst.msk [vmem:[%s2795_s16 + $0x37] sm:$0xff] %vm1109_vm4, %v1760_v44 }
 0x110   : > { %v1766_v13 = vpop.permute.xlu1 %1765  ;;  %v1764_v33 = vpop.permute.xlu0 %1763 }
 0x111   : > { %2045 = vst.msk [vmem:[%s2795_s16 + $0x57] sm:$0xff] %vm1109_vm4, %v1766_v13 }
 0x112   : > { %2044 = vst.msk [vmem:[%s2795_s16 + $0x4f] sm:$0xfe] %vm1107_vm3, %v1764_v33 }
 0x114   : > { %v1770_v22 = vpop.permute.xlu1 %1769  ;;  %v1768_v43 = vpop.permute.xlu0 %1767 }
 0x115   : > { %2047 = vst.msk [vmem:[%s2795_s16 + $0x6f] sm:$0xfe] %vm1107_vm3, %v1770_v22 }
 0x116   : > { %2046 = vst.msk [vmem:[%s2795_s16 + $0x5f] sm:$0x1] %vm1111_vm2, %v1768_v43 }
 0x118   : > { %v1774_v26 = vpop.permute.xlu1 %1773  ;;  %v1772_v52 = vpop.permute.xlu0 %1771 }
 0x119   : > { %2049 = vst.msk [vmem:[%s2795_s16 + $0x7f] sm:$0x1] %vm1111_vm2, %v1774_v26 }
 0x11a   : > { %2048 = vst.msk [vmem:[%s2795_s16 + $0x77] sm:$0xff] %vm1109_vm4, %v1772_v52 }
 0x11c   : > { %v1778_v41 = vpop.permute.xlu1 %1777  ;;  %v1776_v18 = vpop.permute.xlu0 %1775 }
 0x11d   : > { %2051 = vst.msk [vmem:[%s2795_s16 + $0x97] sm:$0xff] %vm1109_vm4, %v1778_v41 }
 0x11e   : > { %2050 = vst.msk [vmem:[%s2795_s16 + $0x8f] sm:$0xfe] %vm1107_vm3, %v1776_v18 }
 0x120   : > { %v1780_v48 = vpop.permute.xlu0 %1779  ;;  %v1782_v28 = vpop.permute.xlu1 %1781 }
 0x121   : > { %2052 = vst.msk [vmem:[%s2795_s16 + $0x9f] sm:$0x1] %vm1111_vm2, %v1780_v48 }
 0x122   : > { %2053 = vst.msk [vmem:[%s2795_s16 + $0xaf] sm:$0xfe] %vm1107_vm3, %v1782_v28 }
 0x124   : > { %v1784_v10 = vpop.permute.xlu0 %1783  ;;  %v1786_v17 = vpop.permute.xlu1 %1785 }
 0x125   : > { %2054 = vst.msk [vmem:[%s2795_s16 + $0xb7] sm:$0xff] %vm1109_vm4, %v1784_v10 }
 0x126   : > { %2055 = vst.msk [vmem:[%s2795_s16 + $0xbf] sm:$0x1] %vm1111_vm2, %v1786_v17 }
 0x128   : > { %v1790_v36 = vpop.permute.xlu1 %1789 }
 0x129   : > { %2057 = vst.msk [vmem:[%s2795_s16 + $0xd7] sm:$0xff] %vm1109_vm4, %v1790_v36 }
 0x12a   : > { %v1788_v61 = vpop.permute.xlu0 %1787 }
 0x12b   : > { %2056 = vst.msk [vmem:[%s2795_s16 + $0xcf] sm:$0xfe] %vm1107_vm3, %v1788_v61 }
 0x12c   : > { %v1794_v53 = vpop.permute.xlu1 %1793 }
 0x12d   : > { %2059 = vst.msk [vmem:[%s2795_s16 + $0xef] sm:$0xfe] %vm1107_vm3, %v1794_v53 }
 0x12e   : > { %v1792_v5 = vpop.permute.xlu0 %1791 }
 0x12f   : > { %2058 = vst.msk [vmem:[%s2795_s16 + $0xdf] sm:$0x1] %vm1111_vm2, %v1792_v5 }
 0x130   : > { %v1798_v19 = vpop.permute.xlu1 %1797 }
 0x131   : > { %2061 = vst.msk [vmem:[%s2795_s16 + $0xff] sm:$0x1] %vm1111_vm2, %v1798_v19 }
 0x132   : > { %v1796_v54 = vpop.permute.xlu0 %1795 }
 0x133   : > { %2060 = vst.msk [vmem:[%s2795_s16 + $0xf7] sm:$0xff] %vm1109_vm4, %v1796_v54 }
 0x134   : > { %v1802_v7 = vpop.permute.xlu1 %1801 }
 0x135   : > { %2063 = vst.msk [vmem:[%s2795_s16 + $0x117] sm:$0xff] %vm1109_vm4, %v1802_v7 }
 0x136   : > { %v1800_v4 = vpop.permute.xlu0 %1799 }
 0x137   : > { %2062 = vst.msk [vmem:[%s2795_s16 + $0x10f] sm:$0xfe] %vm1107_vm3, %v1800_v4 }
 0x138   : > { %v1806_v45 = vpop.permute.xlu1 %1805 }
 0x139   : > { %2065 = vst.msk [vmem:[%s2795_s16 + $0x12f] sm:$0xfe] %vm1107_vm3, %v1806_v45 }
 0x13a   : > { %v1804_v14 = vpop.permute.xlu0 %1803 }
 0x13b   : > { %2064 = vst.msk [vmem:[%s2795_s16 + $0x11f] sm:$0x1] %vm1111_vm2, %v1804_v14 }
 0x13c   : > { %v1810_v55 = vpop.permute.xlu1 %1809 }
 0x13d   : > { %2067 = vst.msk [vmem:[%s2795_s16 + $0x13f] sm:$0x1] %vm1111_vm2, %v1810_v55 }
 0x13e   : > { %v1808_v50 = vpop.permute.xlu0 %1807 }
 0x13f   : > { %2066 = vst.msk [vmem:[%s2795_s16 + $0x137] sm:$0xff] %vm1109_vm4, %v1808_v50 }
 0x140   : > { %v1814_v6 = vpop.permute.xlu1 %1813 }
 0x141   : > { %2069 = vst.msk [vmem:[%s2795_s16 + $0x157] sm:$0xff] %vm1109_vm4, %v1814_v6 }
 0x142   : > { %v1812_v63 = vpop.permute.xlu0 %1811 }
 0x143   : > { %2068 = vst.msk [vmem:[%s2795_s16 + $0x14f] sm:$0xfe] %vm1107_vm3, %v1812_v63 }
 0x144   : > { %v1818_v37 = vpop.permute.xlu1 %1817 }
 0x145   : > { %2071 = vst.msk [vmem:[%s2795_s16 + $0x16f] sm:$0xfe] %vm1107_vm3, %v1818_v37 }
 0x146   : > { %v1816_v59 = vpop.permute.xlu0 %1815 }
 0x147   : > { %2070 = vst.msk [vmem:[%s2795_s16 + $0x15f] sm:$0x1] %vm1111_vm2, %v1816_v59 }
 0x148   : > { %v1822_v16 = vpop.permute.xlu1 %1821 }
 0x149   : > { %2073 = vst.msk [vmem:[%s2795_s16 + $0x17f] sm:$0x1] %vm1111_vm2, %v1822_v16 }
 0x14a   : > { %v1820_v46 = vpop.permute.xlu0 %1819 }
 0x14b   : > { %2072 = vst.msk [vmem:[%s2795_s16 + $0x177] sm:$0xff] %vm1109_vm4, %v1820_v46 }
 0x14c   : > { %v1826_v24 = vpop.permute.xlu1 %1825 }
 0x14d   : > { %2075 = vst.msk [vmem:[%s2795_s16 + $0x197] sm:$0xff] %vm1109_vm4, %v1826_v24 }
 0x14e   : > { %v1824_v30 = vpop.permute.xlu0 %1823 }
 0x14f   : > { %2074 = vst.msk [vmem:[%s2795_s16 + $0x18f] sm:$0xfe] %vm1107_vm3, %v1824_v30 }
 0x150   : > { %v1830_v57 = vpop.permute.xlu1 %1829 }
 0x151   : > { %2077 = vst.msk [vmem:[%s2795_s16 + $0x1af] sm:$0xfe] %vm1107_vm3, %v1830_v57 }
 0x152   : > { %v1828_v8 = vpop.permute.xlu0 %1827 }
 0x153   : > { %2076 = vst.msk [vmem:[%s2795_s16 + $0x19f] sm:$0x1] %vm1111_vm2, %v1828_v8 }
 0x154   : > { %v1834_v9 = vpop.permute.xlu1 %1833 }
 0x155   : > { %2079 = vst.msk [vmem:[%s2795_s16 + $0x1bf] sm:$0x1] %vm1111_vm2, %v1834_v9 }
 0x156   : > { %v1832_v23 = vpop.permute.xlu0 %1831 }
 0x157   : > { %2078 = vst.msk [vmem:[%s2795_s16 + $0x1b7] sm:$0xff] %vm1109_vm4, %v1832_v23 }
 0x159   : > { %v1838_v34 = vpop.permute.xlu1 %1837 }
 0x15a   : > { %2081 = vst.msk [vmem:[%s2795_s16 + $0x1d7] sm:$0xff] %vm1109_vm4, %v1838_v34  ;;  %v1836_v3 = vpop.permute.xlu0 %1835 }
 0x15b   : > { %2080 = vst.msk [vmem:[%s2795_s16 + $0x1cf] sm:$0xfe] %vm1107_vm3, %v1836_v3 }
 0x15d   : > { %v1842_v62 = vpop.permute.xlu1 %1841 }
 0x15e   : > { %2083 = vst.msk [vmem:[%s2795_s16 + $0x1ef] sm:$0xfe] %vm1107_vm3, %v1842_v62  ;;  %v1840_v29 = vpop.permute.xlu0 %1839 }
 0x15f   : > { %2082 = vst.msk [vmem:[%s2795_s16 + $0x1df] sm:$0x1] %vm1111_vm2, %v1840_v29 }
 0x162   : > { %v1846_v49 = vpop.permute.xlu1 %1845  ;;  %v1844_v21 = vpop.permute.xlu0 %1843 }
 0x163   : > { %2085 = vst.msk [vmem:[%s2795_s16 + $0x1ff] sm:$0x1] %vm1111_vm2, %v1846_v49 }
 0x164   : > { %2084 = vst.msk [vmem:[%s2795_s16 + $0x1f7] sm:$0xff] %vm1109_vm4, %v1844_v21 }
 0x165 PF: > { %s11_s6 = sadd.s32 1, %s2107_s6  }
 0x166   : > { %p8_p4 = scmp.ge.s32.totalorder %s11_s6, 4  }
 0x168   :  { %10 = sbr.rel (!%p8_p4) target bundleno = 1 (0x1), region = 55 }

</bundles_post_ra>
